<compile_context>
chip_gen: v5e
topology: v5e:2x2
jax: 0.10.0
libtpu: 0.0.40
codegen_flags: <defaults>
</compile_context>

<pallas_src>
import functools

import numpy as np

import jax
import jax.numpy as jnp
from jax import lax
from jax.experimental import pallas as pl
from jax.experimental.pallas import tpu as pltpu

EPS = 1e-5      # BatchNorm eps
SLOPE = 0.2     # LeakyReLU negative slope
K = 5           # conv kernel size
STRIDE = 2
PAD = 2
LANE = 128


def _round_up(x, m):
    return (x + m - 1) // m * m


# ------------------------------- fused kernel ------------------------------ #

def _netc_fused_kernel(x_ref, w1_ref, w2_ref, w3_ref,
                       avg2_ref, g2_ref, b2_ref,
                       avg3_ref, g3_ref, b3_ref,
                       bmask_ref, wl_ref, bl_ref,
                       out_ref,
                       a2_ref, a3_ref,
                       *, B, B_real, out_class, S1):
    f32 = jnp.float32
    OH1, OH2, OH3 = S1 // 2, S1 // 4, S1 // 8

    # Zero ONLY the H-padding row blocks (q = 0 and q = last) of each parity.
    def zero_pad_blocks(ref):
        Hq = ref.shape[1] // B
        zb = jnp.zeros((B, ref.shape[2]), ref.dtype)
        for p in range(2):
            ref[p, pl.ds(0, B), :] = zb
            ref[p, pl.ds((Hq - 1) * B, B), :] = zb

    zero_pad_blocks(a2_ref)
    zero_pad_blocks(a3_ref)

    def conv(in_ref, w_ref, OH):
        # 5x5/stride-2/pad-2 conv as ONE wide-K MXU matmul: the W gather +
        # W zero-padding live in the pre-stacked weight; the stride-2 H gather
        # is a contiguous row slab per tap of the H-parity-split input scratch.
        # Slabs (each 128 lanes wide) are concatenated along K, so tap
        # accumulation happens inside the MXU (single dot, no VALU adds).
        slabs = [in_ref[kh % 2, pl.ds((kh // 2) * B, OH * B), :] for kh in range(K)]
        stacked = jnp.concatenate(slabs, axis=1)          # (OH*B, K*lane) bf16
        return jnp.dot(stacked, w_ref[...], preferred_element_type=f32)

    def batchnorm(y, avg_ref, g_ref, b_ref, OW):
        # Train-mode BN over (N, H, W).  Columns of y are (ow, c) pairs
        # (c fastest); per-lane mean / E[x^2] come from one row-sum (XLU) plus
        # one tiny matmul with the precomputed channel-select matrix.
        # gamma/beta arrive pre-spread per lane.  Single pass, f32, rsqrt.
        cnt = float(B_real * (y.shape[0] // B) * OW)
        s = jnp.sum(y, axis=0, keepdims=True)                       # (1, lanes)
        ss = jnp.sum(y * y, axis=0, keepdims=True)                  # (1, lanes)
        mean = jnp.dot(s, avg_ref[...], preferred_element_type=f32) * (1.0 / cnt)
        ex2 = jnp.dot(ss, avg_ref[...], preferred_element_type=f32) * (1.0 / cnt)
        var = jnp.maximum(ex2 - mean * mean, 0.0)
        scale = g_ref[...] * lax.rsqrt(var + EPS)                   # (1, lanes)
        shift = b_ref[...] - mean * scale
        return y * scale + shift

    def leaky(y):
        return jnp.maximum(y, SLOPE * y)

    def scatter(y, OH, nxt_ref):
        # Parity split of the layer output (rows = (oh, b)) and TWO block
        # stores into the next layer's H-padded, parity-split input scratch:
        # output row-block oh -> (parity oh % 2, q = oh // 2 + 1).
        half = OH // 2
        y4 = y.reshape(half, 2, B, y.shape[1])            # tile-aligned regroup
        for p in range(2):
            blk = y4[:, p].reshape(half * B, y.shape[1]).astype(nxt_ref.dtype)
            nxt_ref[p, pl.ds(B, half * B), :] = blk

    # conv1 (nc -> ndf) + LeakyReLU
    y1 = leaky(conv(x_ref, w1_ref, OH1))
    scatter(y1, OH1, a2_ref)

    # conv2 (ndf -> 2*ndf) + BatchNorm2 (batch stats) + LeakyReLU
    y2 = leaky(batchnorm(conv(a2_ref, w2_ref, OH2), avg2_ref, g2_ref, b2_ref, OH2))
    if B_real != B:
        # keep padded-batch rows exactly zero so BN3 statistics stay exact
        y2 = y2 * bmask_ref[...]
    scatter(y2, OH2, a3_ref)

    # conv3 (2*ndf -> 4*ndf) + BatchNorm3 + LeakyReLU
    y3 = leaky(batchnorm(conv(a3_ref, w3_ref, OH3), avg3_ref, g3_ref, b3_ref, OH3))

    # aux_linear: torch's NCHW flatten is folded into wl_ref's row permutation.
    y3c = y3.astype(wl_ref.dtype)
    acc = jnp.zeros((B, out_class), f32)
    for h in range(OH3):
        acc = acc + jnp.dot(y3c[h * B:(h + 1) * B, :], wl_ref[h],
                            preferred_element_type=f32)
    out_ref[...] = acc + bl_ref[...]


# --------------------------- one-time weight folding ----------------------- #

def _fold_conv_weight_stacked(wconv, S, kpad):
    """(KH,KW,Cin,Cout) conv weight -> stacked (KH*kpad, OW*Cout) bf16 matrix.

    Per tap kh, row index = (w, cin) of one unpadded input row (zero-padded to
    kpad rows), col index = (ow, cout).  Stride-2 W gather + W zero-padding are
    folded in; the 5 taps are stacked along rows so the kernel does ONE dot."""
    KH, KW, Cin, Cout = wconv.shape
    OW = S // STRIDE
    sel = np.zeros((KW, S, OW), np.float32)
    for kw in range(KW):
        for ow in range(OW):
            w = STRIDE * ow + kw - PAD
            if 0 <= w < S:
                sel[kw, w, ow] = 1.0
    wrow = jnp.einsum("xwo,kxcd->kwcod", jnp.asarray(sel), wconv.astype(jnp.float32))
    wrow = wrow.reshape(KH, S * Cin, OW * Cout)
    if kpad > S * Cin:
        wrow = jnp.pad(wrow, ((0, 0), (0, kpad - S * Cin), (0, 0)))
    return wrow.reshape(KH * kpad, OW * Cout).astype(jnp.bfloat16)


def _channel_select(OW, C):
    """(OW*C, OW*C) f32 matrix M[i,j] = 1 if channel(i) == channel(j)."""
    ch = np.arange(OW * C) % C
    return jnp.asarray((ch[:, None] == ch[None, :]).astype(np.float32))


def fold_params(params, *, ndf, nc, out_class, H=32, W=32):
    """One-time (per model) folding of weights into kernel-ready layouts."""
    assert H == 32 and W == 32, "netC requires 32x32 input"
    S1 = H
    C2, C3 = 2 * ndf, 4 * ndf
    OW1, OW2, OW3 = S1 // 2, S1 // 4, S1 // 8
    kpad1 = _round_up(W * nc, LANE)

    w1s = _fold_conv_weight_stacked(params["w1"], S1, kpad1)            # (5*128, OW1*ndf)
    w2s = _fold_conv_weight_stacked(params["w2"], S1 // 2, OW1 * ndf)   # (5*128, OW2*C2)
    w3s = _fold_conv_weight_stacked(params["w3"], S1 // 4, OW2 * C2)    # (5*128, OW3*C3)

    avg2 = _channel_select(OW2, C2)
    avg3 = _channel_select(OW3, C3)
    g2c = jnp.tile(params["g2"].reshape(1, C2), (1, OW2)).astype(jnp.float32)
    b2c = jnp.tile(params["b2"].reshape(1, C2), (1, OW2)).astype(jnp.float32)
    g3c = jnp.tile(params["g3"].reshape(1, C3), (1, OW3)).astype(jnp.float32)
    b3c = jnp.tile(params["b3"].reshape(1, C3), (1, OW3)).astype(jnp.float32)

    # fold torch's x.view(B, -1) (NCHW flatten) into the linear weight
    wl4 = params["wl"].reshape(out_class, C3, OW3, OW3)        # torch (out, in)
    wl_perm = jnp.transpose(wl4, (2, 3, 1, 0)).reshape(OW3, OW3 * C3, out_class)
    wl_perm = wl_perm.astype(jnp.bfloat16)
    bl = params["bl"].reshape(1, out_class).astype(jnp.float32)

    return dict(w1s=w1s, w2s=w2s, w3s=w3s, avg2=avg2, g2c=g2c, b2c=b2c,
                avg3=avg3, g3c=g3c, b3c=b3c, wl=wl_perm, bl=bl)


# --------------------------- per-call input prep / forward ----------------- #

def _prep_input(x_nchw, B_pad):
    """NCHW -> batch-padded, H-padded, H-parity-split, lane-padded bf16 layout:
    out[p, q*B_pad + b, w*C + c] = x_padded[b, 2q + p, w, c]   (lanes -> 128)."""
    B, C, H, W = x_nchw.shape
    lane = W * C
    lane_p = _round_up(lane, LANE)
    x = jnp.transpose(x_nchw, (0, 2, 3, 1)).reshape(B, H, lane)
    x = jnp.pad(x, ((0, B_pad - B), (PAD, PAD), (0, lane_p - lane)))
    Hq = (H + 2 * PAD) // 2
    x = x.reshape(B_pad, Hq, 2, lane_p)
    x = jnp.transpose(x, (2, 1, 0, 3)).reshape(2, Hq * B_pad, lane_p)
    return x.astype(jnp.bfloat16)


@functools.partial(jax.jit, static_argnames=("ndf", "nc", "out_class"))
def netC_forward(folded, x_nchw, *, ndf, nc, out_class):
    B_real, C, H, W = x_nchw.shape
    assert C == nc
    assert H == 32 and W == 32, "netC requires 32x32 input (output_size = ndf*4*4*4)"
    S1 = H
    OH1, OH2, OH3 = S1 // 2, S1 // 4, S1 // 8
    C2, C3 = 2 * ndf, 4 * ndf
    D = OH1 * ndf                       # lane width of a2 (=128 for ndf=8)

    # sublane-aligned batch (pad with zero images, slice output afterwards)
    B = _round_up(max(B_real, 8), 8)

    x_pre = _prep_input(x_nchw, B)

    # row mask (rows ordered (oh, b)): 1 for real batch elements, 0 for padding
    bm = (np.arange(B) < B_real).astype(np.float32)
    bmask = jnp.asarray(np.tile(bm, OH2)[:, None])          # (OH2*B, 1)

    args = (x_pre, folded["w1s"], folded["w2s"], folded["w3s"],
            folded["avg2"], folded["g2c"], folded["b2c"],
            folded["avg3"], folded["g3c"], folded["b3c"],
            bmask, folded["wl"], folded["bl"])

    in_bytes = sum(int(np.prod(a.shape)) * a.dtype.itemsize for a in args)
    scratch_bytes = (2 * (OH2 + 2) * B * D + 2 * (OH3 + 2) * B * OH2 * C2) * 2
    vmem_limit = int(4 * (in_bytes + scratch_bytes)) + (4 << 20)

    flops = 2 * (OH1 * B * folded["w1s"].shape[0] * folded["w1s"].shape[1]
                 + OH2 * B * folded["w2s"].shape[0] * folded["w2s"].shape[1]
                 + OH3 * B * folded["w3s"].shape[0] * folded["w3s"].shape[1]
                 + B * OH3 * folded["wl"].shape[1] * out_class)
    bytes_accessed = in_bytes + B * out_class * 4

    kern = functools.partial(_netc_fused_kernel, B=B, B_real=B_real,
                             out_class=out_class, S1=S1)

    out = pl.pallas_call(
        kern,
        out_shape=jax.ShapeDtypeStruct((B, out_class), jnp.float32),
        in_specs=[pl.BlockSpec(memory_space=pltpu.MemorySpace.VMEM)] * len(args),
        out_specs=pl.BlockSpec(memory_space=pltpu.MemorySpace.VMEM),
        scratch_shapes=[
            pltpu.VMEM((2, (OH2 + 2) * B, D), jnp.bfloat16),        # conv2 input (H-padded, parity-split)
            pltpu.VMEM((2, (OH3 + 2) * B, OH2 * C2), jnp.bfloat16), # conv3 input
        ],
        compiler_params=pltpu.CompilerParams(vmem_limit_bytes=vmem_limit),
        cost_estimate=pl.CostEstimate(flops=flops, transcendentals=2 * LANE,
                                      bytes_accessed=bytes_accessed),
    )(*args)
    return out[:B_real]


# ------------------------------- init (torch-like) -------------------------- #

def init_params(key, ndf, nc, out_class):
    k1, k2, k3, kg2, kg3, kwl, kbl = jax.random.split(key, 7)
    # conv weights ~ N(0, 0.02)  (weights_init), stored (KH, KW, Cin, Cout)
    w1 = 0.02 * jax.random.normal(k1, (K, K, nc, ndf), jnp.float32)
    w2 = 0.02 * jax.random.normal(k2, (K, K, ndf, 2 * ndf), jnp.float32)
    w3 = 0.02 * jax.random.normal(k3, (K, K, 2 * ndf, 4 * ndf), jnp.float32)
    # BN: gamma ~ N(1, 0.02), beta = 0  (weights_init)
    g2 = 1.0 + 0.02 * jax.random.normal(kg2, (1, 2 * ndf), jnp.float32)
    b2 = jnp.zeros((1, 2 * ndf), jnp.float32)
    g3 = 1.0 + 0.02 * jax.random.normal(kg3, (1, 4 * ndf), jnp.float32)
    b3 = jnp.zeros((1, 4 * ndf), jnp.float32)
    # Linear (torch layout (out, in)): U(-1/sqrt(in), 1/sqrt(in))
    in_f = 4 * ndf * 4 * 4
    bound = 1.0 / (in_f ** 0.5)
    wl = jax.random.uniform(kwl, (out_class, in_f), jnp.float32, -bound, bound)
    bl = jax.random.uniform(kbl, (1, out_class), jnp.float32, -bound, bound)
    return dict(w1=w1, w2=w2, w3=w3, g2=g2, b2=b2, g3=g3, b3=b3, wl=wl, bl=bl)


if __name__ == "__main__":
    # spatial must be 32x32 so three stride-2 convs give 4x4 (output_size = ndf*4*4*4)
    ndf, nc, out_class = 8, 3, 1
    B = 2

    key = jax.random.PRNGKey(0)
    kp, kx = jax.random.split(key)
    params = init_params(kp, ndf, nc, out_class)
    folded = fold_params(params, ndf=ndf, nc=nc, out_class=out_class)  # one-time
    x = jax.random.normal(kx, (B, nc, 32, 32), jnp.float32)

    c = netC_forward(folded, x, ndf=ndf, nc=nc, out_class=out_class)
    jax.block_until_ready(c)
    assert c.shape == (B, out_class), c.shape
    assert bool(jnp.all(jnp.isfinite(c)))
    print("KERNEL_OK")
</pallas_src>

<mosaic_0001>
module attributes {stable_mosaic.version = 11 : i64} {
  func.func @_netc_fused_kernel(%arg0: memref<2x144x128xbf16, #tpu.memory_space<vmem>>, %arg1: memref<640x128xbf16, #tpu.memory_space<vmem>>, %arg2: memref<640x128xbf16, #tpu.memory_space<vmem>>, %arg3: memref<640x128xbf16, #tpu.memory_space<vmem>>, %arg4: memref<128x128xf32, #tpu.memory_space<vmem>>, %arg5: memref<1x128xf32, #tpu.memory_space<vmem>>, %arg6: memref<1x128xf32, #tpu.memory_space<vmem>>, %arg7: memref<128x128xf32, #tpu.memory_space<vmem>>, %arg8: memref<1x128xf32, #tpu.memory_space<vmem>>, %arg9: memref<1x128xf32, #tpu.memory_space<vmem>>, %arg10: memref<64x1xf32, #tpu.memory_space<vmem>>, %arg11: memref<4x128x1xbf16, #tpu.memory_space<vmem>>, %arg12: memref<1x1xf32, #tpu.memory_space<vmem>>, %arg13: memref<8x1xf32, #tpu.memory_space<vmem>>, %arg14: memref<2x80x128xbf16, #tpu.memory_space<vmem>>, %arg15: memref<2x48x128xbf16, #tpu.memory_space<vmem>>) attributes {dimension_semantics = [], scalar_prefetch = 0 : i64, scratch_operands = 2 : i64, tpu.core_type = #tpu.core_type<tc>} {
    %cst = arith.constant 0.000000e+00 : bf16
    %0 = vector.broadcast %cst : bf16 to vector<8x128xbf16>
    %c0 = arith.constant 0 : index
    %c0_0 = arith.constant 0 : index
    %c0_1 = arith.constant 0 : index
    %1 = vector.load %arg14[%c0, %c0_0, %c0_1] : memref<2x80x128xbf16, #tpu.memory_space<vmem>>, vector<1x8x128xbf16>
    %2 = vector.shape_cast %1 : vector<1x8x128xbf16> to vector<8x128xbf16>
    %3 = vector.shape_cast %0 : vector<8x128xbf16> to vector<1x8x128xbf16>
    tpu.vector_store %arg14[%c0, %c0_0, %c0_1], %3 {strides = array<i32>} : memref<2x80x128xbf16, #tpu.memory_space<vmem>>, vector<1x8x128xbf16>,
    %c0_2 = arith.constant 0 : index
    %c72 = arith.constant 72 : index
    %c0_3 = arith.constant 0 : index
    %4 = vector.load %arg14[%c0_2, %c72, %c0_3] : memref<2x80x128xbf16, #tpu.memory_space<vmem>>, vector<1x8x128xbf16>
    %5 = vector.shape_cast %4 : vector<1x8x128xbf16> to vector<8x128xbf16>
    %6 = vector.shape_cast %0 : vector<8x128xbf16> to vector<1x8x128xbf16>
    tpu.vector_store %arg14[%c0_2, %c72, %c0_3], %6 {strides = array<i32>} : memref<2x80x128xbf16, #tpu.memory_space<vmem>>, vector<1x8x128xbf16>,
    %c1 = arith.constant 1 : index
    %c0_4 = arith.constant 0 : index
    %c0_5 = arith.constant 0 : index
    %7 = vector.load %arg14[%c1, %c0_4, %c0_5] : memref<2x80x128xbf16, #tpu.memory_space<vmem>>, vector<1x8x128xbf16>
    %8 = vector.shape_cast %7 : vector<1x8x128xbf16> to vector<8x128xbf16>
    %9 = vector.shape_cast %0 : vector<8x128xbf16> to vector<1x8x128xbf16>
    tpu.vector_store %arg14[%c1, %c0_4, %c0_5], %9 {strides = array<i32>} : memref<2x80x128xbf16, #tpu.memory_space<vmem>>, vector<1x8x128xbf16>,
    %c1_6 = arith.constant 1 : index
    %c72_7 = arith.constant 72 : index
    %c0_8 = arith.constant 0 : index
    %10 = vector.load %arg14[%c1_6, %c72_7, %c0_8] : memref<2x80x128xbf16, #tpu.memory_space<vmem>>, vector<1x8x128xbf16>
    %11 = vector.shape_cast %10 : vector<1x8x128xbf16> to vector<8x128xbf16>
    %12 = vector.shape_cast %0 : vector<8x128xbf16> to vector<1x8x128xbf16>
    tpu.vector_store %arg14[%c1_6, %c72_7, %c0_8], %12 {strides = array<i32>} : memref<2x80x128xbf16, #tpu.memory_space<vmem>>, vector<1x8x128xbf16>,
    %cst_9 = arith.constant 0.000000e+00 : bf16
    %13 = vector.broadcast %cst_9 : bf16 to vector<8x128xbf16>
    %c0_10 = arith.constant 0 : index
    %c0_11 = arith.constant 0 : index
    %c0_12 = arith.constant 0 : index
    %14 = vector.load %arg15[%c0_10, %c0_11, %c0_12] : memref<2x48x128xbf16, #tpu.memory_space<vmem>>, vector<1x8x128xbf16>
    %15 = vector.shape_cast %14 : vector<1x8x128xbf16> to vector<8x128xbf16>
    %16 = vector.shape_cast %13 : vector<8x128xbf16> to vector<1x8x128xbf16>
    tpu.vector_store %arg15[%c0_10, %c0_11, %c0_12], %16 {strides = array<i32>} : memref<2x48x128xbf16, #tpu.memory_space<vmem>>, vector<1x8x128xbf16>,
    %c0_13 = arith.constant 0 : index
    %c40 = arith.constant 40 : index
    %c0_14 = arith.constant 0 : index
    %17 = vector.load %arg15[%c0_13, %c40, %c0_14] : memref<2x48x128xbf16, #tpu.memory_space<vmem>>, vector<1x8x128xbf16>
    %18 = vector.shape_cast %17 : vector<1x8x128xbf16> to vector<8x128xbf16>
    %19 = vector.shape_cast %13 : vector<8x128xbf16> to vector<1x8x128xbf16>
    tpu.vector_store %arg15[%c0_13, %c40, %c0_14], %19 {strides = array<i32>} : memref<2x48x128xbf16, #tpu.memory_space<vmem>>, vector<1x8x128xbf16>,
    %c1_15 = arith.constant 1 : index
    %c0_16 = arith.constant 0 : index
    %c0_17 = arith.constant 0 : index
    %20 = vector.load %arg15[%c1_15, %c0_16, %c0_17] : memref<2x48x128xbf16, #tpu.memory_space<vmem>>, vector<1x8x128xbf16>
    %21 = vector.shape_cast %20 : vector<1x8x128xbf16> to vector<8x128xbf16>
    %22 = vector.shape_cast %13 : vector<8x128xbf16> to vector<1x8x128xbf16>
    tpu.vector_store %arg15[%c1_15, %c0_16, %c0_17], %22 {strides = array<i32>} : memref<2x48x128xbf16, #tpu.memory_space<vmem>>, vector<1x8x128xbf16>,
    %c1_18 = arith.constant 1 : index
    %c40_19 = arith.constant 40 : index
    %c0_20 = arith.constant 0 : index
    %23 = vector.load %arg15[%c1_18, %c40_19, %c0_20] : memref<2x48x128xbf16, #tpu.memory_space<vmem>>, vector<1x8x128xbf16>
    %24 = vector.shape_cast %23 : vector<1x8x128xbf16> to vector<8x128xbf16>
    %25 = vector.shape_cast %13 : vector<8x128xbf16> to vector<1x8x128xbf16>
    tpu.vector_store %arg15[%c1_18, %c40_19, %c0_20], %25 {strides = array<i32>} : memref<2x48x128xbf16, #tpu.memory_space<vmem>>, vector<1x8x128xbf16>,
    %c0_21 = arith.constant 0 : index
    %c0_22 = arith.constant 0 : index
    %c0_23 = arith.constant 0 : index
    %26 = vector.load %arg0[%c0_21, %c0_22, %c0_23] : memref<2x144x128xbf16, #tpu.memory_space<vmem>>, vector<1x128x128xbf16>
    %27 = vector.shape_cast %26 : vector<1x128x128xbf16> to vector<128x128xbf16>
    %c1_24 = arith.constant 1 : index
    %c0_25 = arith.constant 0 : index
    %c0_26 = arith.constant 0 : index
    %28 = vector.load %arg0[%c1_24, %c0_25, %c0_26] : memref<2x144x128xbf16, #tpu.memory_space<vmem>>, vector<1x128x128xbf16>
    %29 = vector.shape_cast %28 : vector<1x128x128xbf16> to vector<128x128xbf16>
    %c0_27 = arith.constant 0 : index
    %c8 = arith.constant 8 : index
    %c0_28 = arith.constant 0 : index
    %30 = vector.load %arg0[%c0_27, %c8, %c0_28] : memref<2x144x128xbf16, #tpu.memory_space<vmem>>, vector<1x128x128xbf16>
    %31 = vector.shape_cast %30 : vector<1x128x128xbf16> to vector<128x128xbf16>
    %c1_29 = arith.constant 1 : index
    %c8_30 = arith.constant 8 : index
    %c0_31 = arith.constant 0 : index
    %32 = vector.load %arg0[%c1_29, %c8_30, %c0_31] : memref<2x144x128xbf16, #tpu.memory_space<vmem>>, vector<1x128x128xbf16>
    %33 = vector.shape_cast %32 : vector<1x128x128xbf16> to vector<128x128xbf16>
    %c0_32 = arith.constant 0 : index
    %c16 = arith.constant 16 : index
    %c0_33 = arith.constant 0 : index
    %34 = vector.load %arg0[%c0_32, %c16, %c0_33] : memref<2x144x128xbf16, #tpu.memory_space<vmem>>, vector<1x128x128xbf16>
    %35 = vector.shape_cast %34 : vector<1x128x128xbf16> to vector<128x128xbf16>
    %36 = tpu.concatenate %27, %29, %31, %33, %35 in 1 : vector<128x128xbf16>, vector<128x128xbf16>, vector<128x128xbf16>, vector<128x128xbf16>, vector<128x128xbf16> -> vector<128x640xbf16>
    %c0_34 = arith.constant 0 : index
    %c0_35 = arith.constant 0 : index
    %37 = vector.load %arg1[%c0_34, %c0_35] : memref<640x128xbf16, #tpu.memory_space<vmem>>, vector<640x128xbf16>
    %cst_36 = arith.constant dense<0.000000e+00> : vector<128x128xf32>
    %38 = tpu.matmul %36, %37, %cst_36 {dimension_numbers = #tpu.dot_dimension_numbers<[1], [0], [0], [1], [0, 0, 1, 1], [], []>} : vector<128x640xbf16>, vector<640x128xbf16>, vector<128x128xf32> -> vector<128x128xf32>
    %cst_37 = arith.constant 2.000000e-01 : f32
    %39 = vector.broadcast %cst_37 : f32 to vector<128x128xf32>
    %40 = arith.mulf %39, %38 : vector<128x128xf32>
    %41 = arith.maximumf %38, %40 : vector<128x128xf32>
    %42 = vector.shape_cast %41 : vector<128x128xf32> to vector<8x2x8x128xf32>
    %43 = vector.extract_strided_slice %42 {offsets = [0, 0, 0, 0], sizes = [8, 1, 8, 128], strides = [1, 1, 1, 1]} : vector<8x2x8x128xf32> to vector<8x1x8x128xf32>
    %44 = vector.shape_cast %43 : vector<8x1x8x128xf32> to vector<8x8x128xf32>
    %45 = vector.shape_cast %44 : vector<8x8x128xf32> to vector<64x128xf32>
    %46 = arith.truncf %45 : vector<64x128xf32> to vector<64x128xbf16>
    %c0_38 = arith.constant 0 : index
    %c8_39 = arith.constant 8 : index
    %c0_40 = arith.constant 0 : index
    %47 = vector.load %arg14[%c0_38, %c8_39, %c0_40] : memref<2x80x128xbf16, #tpu.memory_space<vmem>>, vector<1x64x128xbf16>
    %48 = vector.shape_cast %47 : vector<1x64x128xbf16> to vector<64x128xbf16>
    %49 = vector.shape_cast %46 : vector<64x128xbf16> to vector<1x64x128xbf16>
    tpu.vector_store %arg14[%c0_38, %c8_39, %c0_40], %49 {strides = array<i32>} : memref<2x80x128xbf16, #tpu.memory_space<vmem>>, vector<1x64x128xbf16>,
    %50 = vector.extract_strided_slice %42 {offsets = [0, 1, 0, 0], sizes = [8, 1, 8, 128], strides = [1, 1, 1, 1]} : vector<8x2x8x128xf32> to vector<8x1x8x128xf32>
    %51 = vector.shape_cast %50 : vector<8x1x8x128xf32> to vector<8x8x128xf32>
    %52 = vector.shape_cast %51 : vector<8x8x128xf32> to vector<64x128xf32>
    %53 = arith.truncf %52 : vector<64x128xf32> to vector<64x128xbf16>
    %c1_41 = arith.constant 1 : index
    %c8_42 = arith.constant 8 : index
    %c0_43 = arith.constant 0 : index
    %54 = vector.load %arg14[%c1_41, %c8_42, %c0_43] : memref<2x80x128xbf16, #tpu.memory_space<vmem>>, vector<1x64x128xbf16>
    %55 = vector.shape_cast %54 : vector<1x64x128xbf16> to vector<64x128xbf16>
    %56 = vector.shape_cast %53 : vector<64x128xbf16> to vector<1x64x128xbf16>
    tpu.vector_store %arg14[%c1_41, %c8_42, %c0_43], %56 {strides = array<i32>} : memref<2x80x128xbf16, #tpu.memory_space<vmem>>, vector<1x64x128xbf16>,
    %c0_44 = arith.constant 0 : index
    %c0_45 = arith.constant 0 : index
    %c0_46 = arith.constant 0 : index
    %57 = vector.load %arg14[%c0_44, %c0_45, %c0_46] : memref<2x80x128xbf16, #tpu.memory_space<vmem>>, vector<1x64x128xbf16>
    %58 = vector.shape_cast %57 : vector<1x64x128xbf16> to vector<64x128xbf16>
    %c1_47 = arith.constant 1 : index
    %c0_48 = arith.constant 0 : index
    %c0_49 = arith.constant 0 : index
    %59 = vector.load %arg14[%c1_47, %c0_48, %c0_49] : memref<2x80x128xbf16, #tpu.memory_space<vmem>>, vector<1x64x128xbf16>
    %60 = vector.shape_cast %59 : vector<1x64x128xbf16> to vector<64x128xbf16>
    %c0_50 = arith.constant 0 : index
    %c8_51 = arith.constant 8 : index
    %c0_52 = arith.constant 0 : index
    %61 = vector.load %arg14[%c0_50, %c8_51, %c0_52] : memref<2x80x128xbf16, #tpu.memory_space<vmem>>, vector<1x64x128xbf16>
    %62 = vector.shape_cast %61 : vector<1x64x128xbf16> to vector<64x128xbf16>
    %c1_53 = arith.constant 1 : index
    %c8_54 = arith.constant 8 : index
    %c0_55 = arith.constant 0 : index
    %63 = vector.load %arg14[%c1_53, %c8_54, %c0_55] : memref<2x80x128xbf16, #tpu.memory_space<vmem>>, vector<1x64x128xbf16>
    %64 = vector.shape_cast %63 : vector<1x64x128xbf16> to vector<64x128xbf16>
    %c0_56 = arith.constant 0 : index
    %c16_57 = arith.constant 16 : index
    %c0_58 = arith.constant 0 : index
    %65 = vector.load %arg14[%c0_56, %c16_57, %c0_58] : memref<2x80x128xbf16, #tpu.memory_space<vmem>>, vector<1x64x128xbf16>
    %66 = vector.shape_cast %65 : vector<1x64x128xbf16> to vector<64x128xbf16>
    %67 = tpu.concatenate %58, %60, %62, %64, %66 in 1 : vector<64x128xbf16>, vector<64x128xbf16>, vector<64x128xbf16>, vector<64x128xbf16>, vector<64x128xbf16> -> vector<64x640xbf16>
    %c0_59 = arith.constant 0 : index
    %c0_60 = arith.constant 0 : index
    %68 = vector.load %arg2[%c0_59, %c0_60] : memref<640x128xbf16, #tpu.memory_space<vmem>>, vector<640x128xbf16>
    %cst_61 = arith.constant dense<0.000000e+00> : vector<64x128xf32>
    %69 = tpu.matmul %67, %68, %cst_61 {dimension_numbers = #tpu.dot_dimension_numbers<[1], [0], [0], [1], [0, 0, 1, 1], [], []>} : vector<64x640xbf16>, vector<640x128xbf16>, vector<64x128xf32> -> vector<64x128xf32>
    %cst_62 = arith.constant dense<0.000000e+00> : vector<128xf32>
    %70 = vector.multi_reduction <add>, %69, %cst_62 [0] : vector<64x128xf32> to vector<128xf32>
    %71 = vector.shape_cast %70 : vector<128xf32> to vector<1x128xf32>
    %72 = arith.mulf %69, %69 : vector<64x128xf32>
    %cst_63 = arith.constant dense<0.000000e+00> : vector<128xf32>
    %73 = vector.multi_reduction <add>, %72, %cst_63 [0] : vector<64x128xf32> to vector<128xf32>
    %74 = vector.shape_cast %73 : vector<128xf32> to vector<1x128xf32>
    %c0_64 = arith.constant 0 : index
    %c0_65 = arith.constant 0 : index
    %75 = vector.load %arg4[%c0_64, %c0_65] : memref<128x128xf32, #tpu.memory_space<vmem>>, vector<128x128xf32>
    %cst_66 = arith.constant dense<0.000000e+00> : vector<1x128xf32>
    %76 = tpu.matmul %71, %75, %cst_66 {dimension_numbers = #tpu.dot_dimension_numbers<[1], [0], [0], [1], [0, 0, 1, 1], [], []>} : vector<1x128xf32>, vector<128x128xf32>, vector<1x128xf32> -> vector<1x128xf32>
    %cst_67 = arith.constant 7.812500e-03 : f32
    %77 = vector.broadcast %cst_67 : f32 to vector<1x128xf32>
    %78 = arith.mulf %76, %77 : vector<1x128xf32>
    %c0_68 = arith.constant 0 : index
    %c0_69 = arith.constant 0 : index
    %79 = vector.load %arg4[%c0_68, %c0_69] : memref<128x128xf32, #tpu.memory_space<vmem>>, vector<128x128xf32>
    %cst_70 = arith.constant dense<0.000000e+00> : vector<1x128xf32>
    %80 = tpu.matmul %74, %79, %cst_70 {dimension_numbers = #tpu.dot_dimension_numbers<[1], [0], [0], [1], [0, 0, 1, 1], [], []>} : vector<1x128xf32>, vector<128x128xf32>, vector<1x128xf32> -> vector<1x128xf32>
    %cst_71 = arith.constant 7.812500e-03 : f32
    %81 = vector.broadcast %cst_71 : f32 to vector<1x128xf32>
    %82 = arith.mulf %80, %81 : vector<1x128xf32>
    %83 = arith.mulf %78, %78 : vector<1x128xf32>
    %84 = arith.subf %82, %83 : vector<1x128xf32>
    %cst_72 = arith.constant 0.000000e+00 : f32
    %85 = vector.broadcast %cst_72 : f32 to vector<1x128xf32>
    %86 = arith.maximumf %84, %85 : vector<1x128xf32>
    %c0_73 = arith.constant 0 : index
    %c0_74 = arith.constant 0 : index
    %87 = vector.load %arg5[%c0_73, %c0_74] : memref<1x128xf32, #tpu.memory_space<vmem>>, vector<1x128xf32>
    %cst_75 = arith.constant 9.99999974E-6 : f32
    %88 = vector.broadcast %cst_75 : f32 to vector<1x128xf32>
    %89 = arith.addf %86, %88 : vector<1x128xf32>
    %90 = math.rsqrt %89 : vector<1x128xf32>
    %91 = arith.mulf %87, %90 : vector<1x128xf32>
    %c0_76 = arith.constant 0 : index
    %c0_77 = arith.constant 0 : index
    %92 = vector.load %arg6[%c0_76, %c0_77] : memref<1x128xf32, #tpu.memory_space<vmem>>, vector<1x128xf32>
    %93 = arith.mulf %78, %91 : vector<1x128xf32>
    %94 = arith.subf %92, %93 : vector<1x128xf32>
    %95 = vector.broadcast %91 : vector<1x128xf32> to vector<64x128xf32>
    %96 = arith.mulf %69, %95 : vector<64x128xf32>
    %97 = vector.broadcast %94 : vector<1x128xf32> to vector<64x128xf32>
    %98 = arith.addf %96, %97 : vector<64x128xf32>
    %cst_78 = arith.constant 2.000000e-01 : f32
    %99 = vector.broadcast %cst_78 : f32 to vector<64x128xf32>
    %100 = arith.mulf %99, %98 : vector<64x128xf32>
    %101 = arith.maximumf %98, %100 : vector<64x128xf32>
    %c0_79 = arith.constant 0 : index
    %c0_80 = arith.constant 0 : index
    %102 = vector.load %arg10[%c0_79, %c0_80] : memref<64x1xf32, #tpu.memory_space<vmem>>, vector<64x1xf32>
    %103 = vector.broadcast %102 : vector<64x1xf32> to vector<64x128xf32>
    %104 = arith.mulf %101, %103 : vector<64x128xf32>
    %105 = vector.shape_cast %104 : vector<64x128xf32> to vector<4x2x8x128xf32>
    %106 = vector.extract_strided_slice %105 {offsets = [0, 0, 0, 0], sizes = [4, 1, 8, 128], strides = [1, 1, 1, 1]} : vector<4x2x8x128xf32> to vector<4x1x8x128xf32>
    %107 = vector.shape_cast %106 : vector<4x1x8x128xf32> to vector<4x8x128xf32>
    %108 = vector.shape_cast %107 : vector<4x8x128xf32> to vector<32x128xf32>
    %109 = arith.truncf %108 : vector<32x128xf32> to vector<32x128xbf16>
    %c0_81 = arith.constant 0 : index
    %c8_82 = arith.constant 8 : index
    %c0_83 = arith.constant 0 : index
    %110 = vector.load %arg15[%c0_81, %c8_82, %c0_83] : memref<2x48x128xbf16, #tpu.memory_space<vmem>>, vector<1x32x128xbf16>
    %111 = vector.shape_cast %110 : vector<1x32x128xbf16> to vector<32x128xbf16>
    %112 = vector.shape_cast %109 : vector<32x128xbf16> to vector<1x32x128xbf16>
    tpu.vector_store %arg15[%c0_81, %c8_82, %c0_83], %112 {strides = array<i32>} : memref<2x48x128xbf16, #tpu.memory_space<vmem>>, vector<1x32x128xbf16>,
    %113 = vector.extract_strided_slice %105 {offsets = [0, 1, 0, 0], sizes = [4, 1, 8, 128], strides = [1, 1, 1, 1]} : vector<4x2x8x128xf32> to vector<4x1x8x128xf32>
    %114 = vector.shape_cast %113 : vector<4x1x8x128xf32> to vector<4x8x128xf32>
    %115 = vector.shape_cast %114 : vector<4x8x128xf32> to vector<32x128xf32>
    %116 = arith.truncf %115 : vector<32x128xf32> to vector<32x128xbf16>
    %c1_84 = arith.constant 1 : index
    %c8_85 = arith.constant 8 : index
    %c0_86 = arith.constant 0 : index
    %117 = vector.load %arg15[%c1_84, %c8_85, %c0_86] : memref<2x48x128xbf16, #tpu.memory_space<vmem>>, vector<1x32x128xbf16>
    %118 = vector.shape_cast %117 : vector<1x32x128xbf16> to vector<32x128xbf16>
    %119 = vector.shape_cast %116 : vector<32x128xbf16> to vector<1x32x128xbf16>
    tpu.vector_store %arg15[%c1_84, %c8_85, %c0_86], %119 {strides = array<i32>} : memref<2x48x128xbf16, #tpu.memory_space<vmem>>, vector<1x32x128xbf16>,
    %c0_87 = arith.constant 0 : index
    %c0_88 = arith.constant 0 : index
    %c0_89 = arith.constant 0 : index
    %120 = vector.load %arg15[%c0_87, %c0_88, %c0_89] : memref<2x48x128xbf16, #tpu.memory_space<vmem>>, vector<1x32x128xbf16>
    %121 = vector.shape_cast %120 : vector<1x32x128xbf16> to vector<32x128xbf16>
    %c1_90 = arith.constant 1 : index
    %c0_91 = arith.constant 0 : index
    %c0_92 = arith.constant 0 : index
    %122 = vector.load %arg15[%c1_90, %c0_91, %c0_92] : memref<2x48x128xbf16, #tpu.memory_space<vmem>>, vector<1x32x128xbf16>
    %123 = vector.shape_cast %122 : vector<1x32x128xbf16> to vector<32x128xbf16>
    %c0_93 = arith.constant 0 : index
    %c8_94 = arith.constant 8 : index
    %c0_95 = arith.constant 0 : index
    %124 = vector.load %arg15[%c0_93, %c8_94, %c0_95] : memref<2x48x128xbf16, #tpu.memory_space<vmem>>, vector<1x32x128xbf16>
    %125 = vector.shape_cast %124 : vector<1x32x128xbf16> to vector<32x128xbf16>
    %c1_96 = arith.constant 1 : index
    %c8_97 = arith.constant 8 : index
    %c0_98 = arith.constant 0 : index
    %126 = vector.load %arg15[%c1_96, %c8_97, %c0_98] : memref<2x48x128xbf16, #tpu.memory_space<vmem>>, vector<1x32x128xbf16>
    %127 = vector.shape_cast %126 : vector<1x32x128xbf16> to vector<32x128xbf16>
    %c0_99 = arith.constant 0 : index
    %c16_100 = arith.constant 16 : index
    %c0_101 = arith.constant 0 : index
    %128 = vector.load %arg15[%c0_99, %c16_100, %c0_101] : memref<2x48x128xbf16, #tpu.memory_space<vmem>>, vector<1x32x128xbf16>
    %129 = vector.shape_cast %128 : vector<1x32x128xbf16> to vector<32x128xbf16>
    %130 = tpu.concatenate %121, %123, %125, %127, %129 in 1 : vector<32x128xbf16>, vector<32x128xbf16>, vector<32x128xbf16>, vector<32x128xbf16>, vector<32x128xbf16> -> vector<32x640xbf16>
    %c0_102 = arith.constant 0 : index
    %c0_103 = arith.constant 0 : index
    %131 = vector.load %arg3[%c0_102, %c0_103] : memref<640x128xbf16, #tpu.memory_space<vmem>>, vector<640x128xbf16>
    %cst_104 = arith.constant dense<0.000000e+00> : vector<32x128xf32>
    %132 = tpu.matmul %130, %131, %cst_104 {dimension_numbers = #tpu.dot_dimension_numbers<[1], [0], [0], [1], [0, 0, 1, 1], [], []>} : vector<32x640xbf16>, vector<640x128xbf16>, vector<32x128xf32> -> vector<32x128xf32>
    %cst_105 = arith.constant dense<0.000000e+00> : vector<128xf32>
    %133 = vector.multi_reduction <add>, %132, %cst_105 [0] : vector<32x128xf32> to vector<128xf32>
    %134 = vector.shape_cast %133 : vector<128xf32> to vector<1x128xf32>
    %135 = arith.mulf %132, %132 : vector<32x128xf32>
    %cst_106 = arith.constant dense<0.000000e+00> : vector<128xf32>
    %136 = vector.multi_reduction <add>, %135, %cst_106 [0] : vector<32x128xf32> to vector<128xf32>
    %137 = vector.shape_cast %136 : vector<128xf32> to vector<1x128xf32>
    %c0_107 = arith.constant 0 : index
    %c0_108 = arith.constant 0 : index
    %138 = vector.load %arg7[%c0_107, %c0_108] : memref<128x128xf32, #tpu.memory_space<vmem>>, vector<128x128xf32>
    %cst_109 = arith.constant dense<0.000000e+00> : vector<1x128xf32>
    %139 = tpu.matmul %134, %138, %cst_109 {dimension_numbers = #tpu.dot_dimension_numbers<[1], [0], [0], [1], [0, 0, 1, 1], [], []>} : vector<1x128xf32>, vector<128x128xf32>, vector<1x128xf32> -> vector<1x128xf32>
    %cst_110 = arith.constant 3.125000e-02 : f32
    %140 = vector.broadcast %cst_110 : f32 to vector<1x128xf32>
    %141 = arith.mulf %139, %140 : vector<1x128xf32>
    %c0_111 = arith.constant 0 : index
    %c0_112 = arith.constant 0 : index
    %142 = vector.load %arg7[%c0_111, %c0_112] : memref<128x128xf32, #tpu.memory_space<vmem>>, vector<128x128xf32>
    %cst_113 = arith.constant dense<0.000000e+00> : vector<1x128xf32>
    %143 = tpu.matmul %137, %142, %cst_113 {dimension_numbers = #tpu.dot_dimension_numbers<[1], [0], [0], [1], [0, 0, 1, 1], [], []>} : vector<1x128xf32>, vector<128x128xf32>, vector<1x128xf32> -> vector<1x128xf32>
    %cst_114 = arith.constant 3.125000e-02 : f32
    %144 = vector.broadcast %cst_114 : f32 to vector<1x128xf32>
    %145 = arith.mulf %143, %144 : vector<1x128xf32>
    %146 = arith.mulf %141, %141 : vector<1x128xf32>
    %147 = arith.subf %145, %146 : vector<1x128xf32>
    %cst_115 = arith.constant 0.000000e+00 : f32
    %148 = vector.broadcast %cst_115 : f32 to vector<1x128xf32>
    %149 = arith.maximumf %147, %148 : vector<1x128xf32>
    %c0_116 = arith.constant 0 : index
    %c0_117 = arith.constant 0 : index
    %150 = vector.load %arg8[%c0_116, %c0_117] : memref<1x128xf32, #tpu.memory_space<vmem>>, vector<1x128xf32>
    %cst_118 = arith.constant 9.99999974E-6 : f32
    %151 = vector.broadcast %cst_118 : f32 to vector<1x128xf32>
    %152 = arith.addf %149, %151 : vector<1x128xf32>
    %153 = math.rsqrt %152 : vector<1x128xf32>
    %154 = arith.mulf %150, %153 : vector<1x128xf32>
    %c0_119 = arith.constant 0 : index
    %c0_120 = arith.constant 0 : index
    %155 = vector.load %arg9[%c0_119, %c0_120] : memref<1x128xf32, #tpu.memory_space<vmem>>, vector<1x128xf32>
    %156 = arith.mulf %141, %154 : vector<1x128xf32>
    %157 = arith.subf %155, %156 : vector<1x128xf32>
    %158 = vector.broadcast %154 : vector<1x128xf32> to vector<32x128xf32>
    %159 = arith.mulf %132, %158 : vector<32x128xf32>
    %160 = vector.broadcast %157 : vector<1x128xf32> to vector<32x128xf32>
    %161 = arith.addf %159, %160 : vector<32x128xf32>
    %cst_121 = arith.constant 2.000000e-01 : f32
    %162 = vector.broadcast %cst_121 : f32 to vector<32x128xf32>
    %163 = arith.mulf %162, %161 : vector<32x128xf32>
    %164 = arith.maximumf %161, %163 : vector<32x128xf32>
    %165 = arith.truncf %164 : vector<32x128xf32> to vector<32x128xbf16>
    %cst_122 = arith.constant 0.000000e+00 : f32
    %166 = vector.broadcast %cst_122 : f32 to vector<8x1xf32>
    %167 = vector.extract_strided_slice %165 {offsets = [0, 0], sizes = [8, 128], strides = [1, 1]} : vector<32x128xbf16> to vector<8x128xbf16>
    %c0_123 = arith.constant 0 : index
    %c0_124 = arith.constant 0 : index
    %c0_125 = arith.constant 0 : index
    %168 = vector.load %arg11[%c0_123, %c0_124, %c0_125] : memref<4x128x1xbf16, #tpu.memory_space<vmem>>, vector<1x128x1xbf16>
    %169 = vector.shape_cast %168 : vector<1x128x1xbf16> to vector<128x1xbf16>
    %cst_126 = arith.constant dense<0.000000e+00> : vector<8x1xf32>
    %170 = tpu.matmul %167, %169, %cst_126 {dimension_numbers = #tpu.dot_dimension_numbers<[1], [0], [0], [1], [0, 0, 1, 1], [], []>} : vector<8x128xbf16>, vector<128x1xbf16>, vector<8x1xf32> -> vector<8x1xf32>
    %171 = arith.addf %166, %170 : vector<8x1xf32>
    %172 = vector.extract_strided_slice %165 {offsets = [8, 0], sizes = [8, 128], strides = [1, 1]} : vector<32x128xbf16> to vector<8x128xbf16>
    %c1_127 = arith.constant 1 : index
    %c0_128 = arith.constant 0 : index
    %c0_129 = arith.constant 0 : index
    %173 = vector.load %arg11[%c1_127, %c0_128, %c0_129] : memref<4x128x1xbf16, #tpu.memory_space<vmem>>, vector<1x128x1xbf16>
    %174 = vector.shape_cast %173 : vector<1x128x1xbf16> to vector<128x1xbf16>
    %cst_130 = arith.constant dense<0.000000e+00> : vector<8x1xf32>
    %175 = tpu.matmul %172, %174, %cst_130 {dimension_numbers = #tpu.dot_dimension_numbers<[1], [0], [0], [1], [0, 0, 1, 1], [], []>} : vector<8x128xbf16>, vector<128x1xbf16>, vector<8x1xf32> -> vector<8x1xf32>
    %176 = arith.addf %171, %175 : vector<8x1xf32>
    %177 = vector.extract_strided_slice %165 {offsets = [16, 0], sizes = [8, 128], strides = [1, 1]} : vector<32x128xbf16> to vector<8x128xbf16>
    %c2 = arith.constant 2 : index
    %c0_131 = arith.constant 0 : index
    %c0_132 = arith.constant 0 : index
    %178 = vector.load %arg11[%c2, %c0_131, %c0_132] : memref<4x128x1xbf16, #tpu.memory_space<vmem>>, vector<1x128x1xbf16>
    %179 = vector.shape_cast %178 : vector<1x128x1xbf16> to vector<128x1xbf16>
    %cst_133 = arith.constant dense<0.000000e+00> : vector<8x1xf32>
    %180 = tpu.matmul %177, %179, %cst_133 {dimension_numbers = #tpu.dot_dimension_numbers<[1], [0], [0], [1], [0, 0, 1, 1], [], []>} : vector<8x128xbf16>, vector<128x1xbf16>, vector<8x1xf32> -> vector<8x1xf32>
    %181 = arith.addf %176, %180 : vector<8x1xf32>
    %182 = vector.extract_strided_slice %165 {offsets = [24, 0], sizes = [8, 128], strides = [1, 1]} : vector<32x128xbf16> to vector<8x128xbf16>
    %c3 = arith.constant 3 : index
    %c0_134 = arith.constant 0 : index
    %c0_135 = arith.constant 0 : index
    %183 = vector.load %arg11[%c3, %c0_134, %c0_135] : memref<4x128x1xbf16, #tpu.memory_space<vmem>>, vector<1x128x1xbf16>
    %184 = vector.shape_cast %183 : vector<1x128x1xbf16> to vector<128x1xbf16>
    %cst_136 = arith.constant dense<0.000000e+00> : vector<8x1xf32>
    %185 = tpu.matmul %182, %184, %cst_136 {dimension_numbers = #tpu.dot_dimension_numbers<[1], [0], [0], [1], [0, 0, 1, 1], [], []>} : vector<8x128xbf16>, vector<128x1xbf16>, vector<8x1xf32> -> vector<8x1xf32>
    %186 = arith.addf %181, %185 : vector<8x1xf32>
    %c0_137 = arith.constant 0 : index
    %c0_138 = arith.constant 0 : index
    %187 = vector.load %arg12[%c0_137, %c0_138] : memref<1x1xf32, #tpu.memory_space<vmem>>, vector<1x1xf32>
    %188 = vector.broadcast %187 : vector<1x1xf32> to vector<8x1xf32>
    %189 = arith.addf %186, %188 : vector<8x1xf32>
    %c0_139 = arith.constant 0 : index
    %c0_140 = arith.constant 0 : index
    %190 = vector.load %arg13[%c0_139, %c0_140] : memref<8x1xf32, #tpu.memory_space<vmem>>, vector<8x1xf32>
    tpu.vector_store %arg13[%c0_139, %c0_140], %189 {strides = array<i32>} : memref<8x1xf32, #tpu.memory_space<vmem>>, vector<8x1xf32>,
    return
  }
}

</mosaic_0001>

<bundles_post_ra>
// kernel: netC_forward.1
= control target key start
LH: loop header
LB: loop body
LE: loop exit
PB: predicated region body
PF: predicated region fallthrough
CT: control target
= control target key end

     0   :  { %vm2544_vm6 = vcmask 7168   ;;  %s4720_s1 = inlined_call_operand.vmem [shape: bf16[640,128], index: 1, kind: input, shape index: {}]   ;;  %s4721_s0 = inlined_call_operand.vmem [shape: bf16[2,144,128], index: 0, kind: input, shape index: {}]   ;;  %s4722_s2 = inlined_call_operand.vmem [shape: bf16[640,128], index: 2, kind: input, shape index: {}]   ;;  %s4723_s4 = inlined_call_operand.vmem [shape: f32[128,128], index: 4, kind: input, shape index: {}]   ;;  %s4724_s10 = inlined_call_operand.vmem [shape: f32[64,1], index: 10, kind: input, shape index: {}]   ;;  %s4725_s3 = inlined_call_operand.vmem [shape: bf16[640,128], index: 3, kind: input, shape index: {}]   ;;  %s4726_s5 = inlined_call_operand.vmem [shape: f32[1,128], index: 5, kind: input, shape index: {}]   ;;  %s4727_s6 = inlined_call_operand.vmem [shape: f32[1,128], index: 6, kind: input, shape index: {}]   ;;  %s4728_s7 = inlined_call_operand.vmem [shape: f32[128,128], index: 7, kind: input, shape index: {}]   ;;  %s4729_s11 = inlined_call_operand.vmem [shape: bf16[4,128,1], index: 11, kind: input, shape index: {}]   ;;  %s4730_s8 = inlined_call_operand.vmem [shape: f32[1,128], index: 8, kind: input, shape index: {}]   ;;  %s4731_s9 = inlined_call_operand.vmem [shape: f32[1,128], index: 9, kind: input, shape index: {}]   ;;  %s4732_s12 = inlined_call_operand.<no memory space> [shape: f32[1,1], index: 12, kind: input, shape index: {}]   ;;  %s4733_s13 = inlined_call_operand.vmem [shape: f32[8,1], index: 13, kind: output, shape index: {}]  }
   0x1   :  { %v3230_v0 = vld [vmem:[%s4720_s1 + $0x38] sm:$0xff]  ;;  %v3229_v4 = vld [vmem:[%s4720_s1 + $0x30] sm:$0xff]  ;;  %v3228_v8 = vld [vmem:[%s4720_s1 + $0x28] sm:$0xff] }
   0x2   :  { %v3238_v1 = vld [vmem:[%s4720_s1 + $0x78] sm:$0xff]  ;;  %549 = vmatpush.bf16.msra.mxu0 %v3230_v0  ;;  %v3237_v5 = vld [vmem:[%s4720_s1 + $0x70] sm:$0xff]  ;;  %v3236_v9 = vld [vmem:[%s4720_s1 + $0x68] sm:$0xff] }
   0x3   :  { %v3246_v2 = vld [vmem:[%s4720_s1 + $0xb8] sm:$0xff]  ;;  %598 = vmatpush.bf16.msra.mxu1 %v3238_v1  ;;  %v3245_v6 = vld [vmem:[%s4720_s1 + $0xb0] sm:$0xff]  ;;  %v3244_v10 = vld [vmem:[%s4720_s1 + $0xa8] sm:$0xff] }
   0x4   :  { %v3254_v3 = vld [vmem:[%s4720_s1 + $0xf8] sm:$0xff]  ;;  %647 = vmatpush.bf16.msra.mxu2 %v3246_v2  ;;  %v3253_v7 = vld [vmem:[%s4720_s1 + $0xf0] sm:$0xff]  ;;  %v3252_v11 = vld [vmem:[%s4720_s1 + $0xe8] sm:$0xff] }
   0x5   :  { %696 = vmatpush.bf16.msra.mxu3 %v3254_v3  ;;  %v3227_v12 = vld [vmem:[%s4720_s1 + $0x20] sm:$0xff]  ;;  %v3226_v16 = vld [vmem:[%s4720_s1 + $0x18] sm:$0xff]  ;;  %v3225_v20 = vld [vmem:[%s4720_s1 + $0x10] sm:$0xff] }
   0x6   :  { %550 = vmatpush.bf16.msra.mxu0 %v3229_v4  ;;  %v3235_v13 = vld [vmem:[%s4720_s1 + $0x60] sm:$0xff]  ;;  %v3234_v17 = vld [vmem:[%s4720_s1 + $0x58] sm:$0xff]  ;;  %v3233_v21 = vld [vmem:[%s4720_s1 + $0x50] sm:$0xff] }
   0x7   :  { %599 = vmatpush.bf16.msra.mxu1 %v3237_v5  ;;  %v3243_v14 = vld [vmem:[%s4720_s1 + $0xa0] sm:$0xff]  ;;  %v3242_v18 = vld [vmem:[%s4720_s1 + $0x98] sm:$0xff]  ;;  %v3241_v22 = vld [vmem:[%s4720_s1 + $0x90] sm:$0xff] }
   0x8   :  { %648 = vmatpush.bf16.msra.mxu2 %v3245_v6  ;;  %v3251_v15 = vld [vmem:[%s4720_s1 + $0xe0] sm:$0xff]  ;;  %v3250_v19 = vld [vmem:[%s4720_s1 + $0xd8] sm:$0xff]  ;;  %v3249_v23 = vld [vmem:[%s4720_s1 + $0xd0] sm:$0xff] }
   0x9   :  { %697 = vmatpush.bf16.msra.mxu3 %v3253_v7  ;;  %v3224_v24 = vld [vmem:[%s4720_s1 + $0x8] sm:$0xff]  ;;  %v3223_v28 = vld [vmem:[%s4720_s1] sm:$0xff]  ;;  %v3262_v32 = vld [vmem:[%s4720_s1 + $0x138] sm:$0xff] }
   0xa   :  { %551 = vmatpush.bf16.msra.mxu0 %v3228_v8  ;;  %v3232_v25 = vld [vmem:[%s4720_s1 + $0x48] sm:$0xff]  ;;  %v3231_v29 = vld [vmem:[%s4720_s1 + $0x40] sm:$0xff]  ;;  %v3261_v37 = vld [vmem:[%s4720_s1 + $0x130] sm:$0xff] }
   0xb   :  { %600 = vmatpush.bf16.msra.mxu1 %v3236_v9  ;;  %v3240_v26 = vld [vmem:[%s4720_s1 + $0x88] sm:$0xff]  ;;  %v3239_v30 = vld [vmem:[%s4720_s1 + $0x80] sm:$0xff]  ;;  %v3547_v40 = vld [vmem:[%s4721_s0 + $0x50] sm:$0xff]  }
   0xc   :  { %649 = vmatpush.bf16.msra.mxu2 %v3244_v10  ;;  %v3248_v27 = vld [vmem:[%s4720_s1 + $0xc8] sm:$0xff]  ;;  %v3247_v31 = vld [vmem:[%s4720_s1 + $0xc0] sm:$0xff]  ;;  %v3716_v42 = vld [vmem:[%s4721_s0 + $0x54] sm:$0xff]  }
   0xd   :  { %698 = vmatpush.bf16.msra.mxu3 %v3252_v11  ;;  %v3376_v33 = vld [vmem:[%s4721_s0] sm:$0xff]   ;;  %v3546_v34 = vld [vmem:[%s4721_s0 + $0x48] sm:$0xff]   ;;  %v3540_v44 = vld [vmem:[%s4721_s0 + $0x10] sm:$0xff]  }
   0xe   :  { %552 = vmatpush.bf16.msra.mxu0 %v3227_v12  ;;  %v3700_v35 = vld [vmem:[%s4721_s0 + $0x4] sm:$0xff]   ;;  %v3714_v36 = vld [vmem:[%s4721_s0 + $0x4c] sm:$0xff]   ;;  %v3548_v45 = vld [vmem:[%s4721_s0 + $0x58] sm:$0xff]  }
   0xf   :  { %601 = vmatpush.bf16.msra.mxu1 %v3235_v13  ;;  %v3260_v38 = vld [vmem:[%s4720_s1 + $0x128] sm:$0xff]  ;;  %v3259_v43 = vld [vmem:[%s4720_s1 + $0x120] sm:$0xff]  ;;  %v3704_v46 = vld [vmem:[%s4721_s0 + $0x14] sm:$0xff]  }
  0x10   :  { %650 = vmatpush.bf16.msra.mxu2 %v3243_v14  ;;  %v3969_v39 = vld [vmem:[%s4721_s0 + $0x8] sm:$0xff]   ;;  %v3718_v47 = vld [vmem:[%s4721_s0 + $0x5c] sm:$0xff]   ;;  %v3257_v53 = vld [vmem:[%s4720_s1 + $0x110] sm:$0xff] }
  0x11   :  { %699 = vmatpush.bf16.msra.mxu3 %v3251_v15  ;;  %v3702_v41 = vld [vmem:[%s4721_s0 + $0xc] sm:$0xff]   ;;  %v3258_v48 = vld [vmem:[%s4720_s1 + $0x118] sm:$0xff]  ;;  %v3549_v50 = vld [vmem:[%s4721_s0 + $0x60] sm:$0xff]  }
  0x12   :  { %553 = vmatpush.bf16.msra.mxu0 %v3226_v16  ;;  %v3541_v49 = vld [vmem:[%s4721_s0 + $0x18] sm:$0xff]   ;;  %v3720_v52 = vld [vmem:[%s4721_s0 + $0x64] sm:$0xff]   ;;  %v3722_v57 = vld [vmem:[%s4721_s0 + $0x6c] sm:$0xff]  }
  0x13   :  { %602 = vmatpush.bf16.msra.mxu1 %v3234_v17  ;;  %v3706_v51 = vld [vmem:[%s4721_s0 + $0x1c] sm:$0xff]   ;;  %v3550_v55 = vld [vmem:[%s4721_s0 + $0x68] sm:$0xff]   ;;  %v3551_v60 = vld [vmem:[%s4721_s0 + $0x70] sm:$0xff]  }
  0x14   :  { %651 = vmatpush.bf16.msra.mxu2 %v3242_v18  ;;  %v3542_v54 = vld [vmem:[%s4721_s0 + $0x20] sm:$0xff]   ;;  %v3256_v58 = vld [vmem:[%s4720_s1 + $0x108] sm:$0xff]  ;;  %v3724_v62 = vld [vmem:[%s4721_s0 + $0x74] sm:$0xff]  }
  0x15   :  { %700 = vmatpush.bf16.msra.mxu3 %v3250_v19  ;;  %v3708_v56 = vld [vmem:[%s4721_s0 + $0x24] sm:$0xff]   ;;  %v3710_v61 = vld [vmem:[%s4721_s0 + $0x2c] sm:$0xff]   ;;  %v3552_v1 = vld [vmem:[%s4721_s0 + $0x78] sm:$0xff]  }
  0x16   :  { %554 = vmatpush.bf16.msra.mxu0 %v3225_v20  ;;  %v3543_v59 = vld [vmem:[%s4721_s0 + $0x28] sm:$0xff]   ;;  %v3255_v63 = vld [vmem:[%s4720_s1 + $0x100] sm:$0xff]  ;;  %v3544_v0 = vld [vmem:[%s4721_s0 + $0x30] sm:$0xff]  }
  0x17   :  { %603 = vmatpush.bf16.msra.mxu1 %v3233_v21  ;;  %v3711_v2 = vld [vmem:[%s4721_s0 + $0x34] sm:$0xff]   ;;  %v3726_v3 = vld [vmem:[%s4721_s0 + $0x7c] sm:$0xff]   ;;  %v3727_v7 = vld [vmem:[%s4721_s0 + $0x84] sm:$0xff] }
  0x18   :  { %652 = vmatpush.bf16.msra.mxu2 %v3241_v22  ;;  %v3545_v4 = vld [vmem:[%s4721_s0 + $0x38] sm:$0xff]   ;;  %v3553_v5 = vld [vmem:[%s4721_s0 + $0x80] sm:$0xff]   ;;  %v3277_v18 = vld [vmem:[%s4722_s2 + $0x70] sm:$0xff] }
  0x19   :  { %701 = vmatpush.bf16.msra.mxu3 %v3249_v23  ;;  %v3764_v6 = vld [vmem:[%s4721_s0 + $0x3c] sm:$0xff]   ;;  %v3269_v19 = vld [vmem:[%s4722_s2 + $0x30] sm:$0xff]  ;;  %v3276_v22 = vld [vmem:[%s4722_s2 + $0x68] sm:$0xff] }
  0x1a   :  { %555 = vmatpush.bf16.msra.mxu0 %v3224_v24  ;;  %v3278_v14 = vld [vmem:[%s4722_s2 + $0x78] sm:$0xff]  ;;  %v3268_v23 = vld [vmem:[%s4722_s2 + $0x28] sm:$0xff] }
  0x1b   :  { %604 = vmatpush.bf16.msra.mxu1 %v3232_v25  ;;  %v3270_v15 = vld [vmem:[%s4722_s2 + $0x38] sm:$0xff] }
  0x1c   :  { %653 = vmatpush.bf16.msra.mxu2 %v3240_v26 }
  0x1d   :  { %702 = vmatpush.bf16.msra.mxu3 %v3248_v27 }
  0x1e   :  { %556 = vmatpush.bf16.msra.mxu0 %v3223_v28  ;;  %v3275_v28 = vld [vmem:[%s4722_s2 + $0x60] sm:$0xff] }
  0x1f   :  { %605 = vmatpush.bf16.msra.mxu1 %v3231_v29  ;;  %v3267_v29 = vld [vmem:[%s4722_s2 + $0x20] sm:$0xff] }
  0x20   :  { %654 = vmatpush.bf16.msra.mxu2 %v3239_v30 }
  0x21   :  { %703 = vmatpush.bf16.msra.mxu3 %v3247_v31  ;;  %557 = vmatmul.bf16.vlgmr.msra.gmra.mxu0 %v3376_v33 }
  0x22   :  { %745 = vmatpush.bf16.msrb.mxu0 %v3262_v32  ;;  %606 = vmatmul.bf16.vlgmr.msra.gmra.mxu1 %v3546_v34  ;;  %v3266_v32 = vld [vmem:[%s4722_s2 + $0x18] sm:$0xff] }
  0x23   :  { %655 = vmatmul.bf16.vlgmr.msra.gmra.mxu2 %v3700_v35  ;;  %1269 = vmatpush.bf16.msrb.mxu1 %v3270_v15  ;;  %v3265_v35 = vld [vmem:[%s4722_s2 + $0x10] sm:$0xff] }
  0x24   :  { %704 = vmatmul.bf16.vlgmr.msra.gmra.mxu3 %v3714_v36  ;;  %1298 = vmatpush.bf16.msrb.mxu2 %v3278_v14 }
  0x26   :  { %746 = vmatpush.bf16.msrb.mxu0 %v3261_v37 }
  0x27   :  { %1270 = vmatpush.bf16.msrb.mxu1 %v3269_v19  ;;  %v3280_v19 = vld [vmem:[%s4722_s2 + $0x88] sm:$0xff] }
  0x28   :  { %1299 = vmatpush.bf16.msrb.mxu2 %v3277_v18 }
  0x2a   :  { %747 = vmatpush.bf16.msrb.mxu0 %v3260_v38  ;;  %v3286_v38 = vld [vmem:[%s4722_s2 + $0xb8] sm:$0xff] }
  0x2b   :  { %1271 = vmatpush.bf16.msrb.mxu1 %v3268_v23  ;;  %1327 = vmatpush.bf16.msrb.mxu3 %v3286_v38 }
  0x2c   :  { %1300 = vmatpush.bf16.msrb.mxu2 %v3276_v22 }
  0x2e   :  { %748 = vmatpush.bf16.msrb.mxu0 %v3259_v43  ;;  %v3263_v43 = vld [vmem:[%s4722_s2] sm:$0xff] }
  0x2f   :  { %1272 = vmatpush.bf16.msrb.mxu1 %v3267_v29 }
  0x30   :  { %1301 = vmatpush.bf16.msrb.mxu2 %v3275_v28 }
  0x31   :  { %562 = vmatmul.bf16.gmra.mxu0 %v3969_v39 }
  0x32   :  { %611 = vmatmul.bf16.gmra.mxu1 %v3547_v40  ;;  %749 = vmatpush.bf16.msrb.mxu0 %v3258_v48  ;;  %v3264_v40 = vld [vmem:[%s4722_s2 + $0x8] sm:$0xff] }
  0x33   :  { %660 = vmatmul.bf16.gmra.mxu2 %v3702_v41  ;;  %1273 = vmatpush.bf16.msrb.mxu1 %v3266_v32  ;;  %v3778_v41 = vmov 0   ;;  %v3272_v48 = vld [vmem:[%s4722_s2 + $0x48] sm:$0xff] }
  0x34   :  { %709 = vmatmul.bf16.gmra.mxu3 %v3716_v42  ;;  %47 = vst [vmem:[#allocation2] sm:$0xf] %v3778_v41  ;;  %3771 = vset.pattern.permute.xlu1 %v3778_v41 }
  0x35   :  { %3770 = vset.pattern.permute.xlu0 %v3778_v41  ;;  %3772 = vset.pattern.permute.xlu2 %v3778_v41  ;;  %48 = vst [vmem:[#allocation2 + $0x24] sm:$0xf] %v3778_v41 }
  0x36   :  { %750 = vmatpush.bf16.msrb.mxu0 %v3257_v53  ;;  %50 = vst [vmem:[#allocation2 + $0x28] sm:$0xf] %v3778_v41 }
  0x37   :  { %1274 = vmatpush.bf16.msrb.mxu1 %v3265_v35  ;;  %52 = vst [vmem:[#allocation3] sm:$0xf] %v3778_v41 }
  0x38   :  { %53 = vst [vmem:[#allocation3 + $0x14] sm:$0xf] %v3778_v41 }
  0x39   :  { %55 = vst [vmem:[#allocation3 + $0x18] sm:$0xf] %v3778_v41 }
  0x3a   :  { %751 = vmatpush.bf16.msrb.mxu0 %v3256_v58 }
  0x3b   :  { %1275 = vmatpush.bf16.msrb.mxu1 %v3264_v40 }
  0x3e   :  { %752 = vmatpush.bf16.msrb.mxu0 %v3255_v63 }
  0x3f   :  { %1276 = vmatpush.bf16.msrb.mxu1 %v3263_v43 }
  0x41   :  { %567 = vmatmul.bf16.gmra.mxu0 %v3540_v44 }
  0x42   :  { %616 = vmatmul.bf16.gmra.mxu1 %v3548_v45 }
  0x43   :  { %665 = vmatmul.bf16.gmra.mxu2 %v3704_v46 }
  0x44   :  { %714 = vmatmul.bf16.gmra.mxu3 %v3718_v47  ;;  %v3554_v47 = vld [vmem:[%s4721_s0 + $0x40] sm:$0xff]  }
  0x51   :  { %572 = vmatmul.bf16.gmra.mxu0 %v3541_v49 }
  0x52   :  { %621 = vmatmul.bf16.gmra.mxu1 %v3549_v50  ;;  %v3285_v50 = vld [vmem:[%s4722_s2 + $0xb0] sm:$0xff] }
  0x53   :  { %670 = vmatmul.bf16.gmra.mxu2 %v3706_v51  ;;  %v3271_v51 = vld [vmem:[%s4722_s2 + $0x40] sm:$0xff]  ;;  %1328 = vmatpush.bf16.msrb.mxu3 %v3285_v50 }
  0x54   :  { %719 = vmatmul.bf16.gmra.mxu3 %v3720_v52 }
  0x61   :  { %577 = vmatmul.bf16.gmra.mxu0 %v3542_v54 }
  0x62   :  { %626 = vmatmul.bf16.gmra.mxu1 %v3550_v55 }
  0x63   :  { %675 = vmatmul.bf16.gmra.mxu2 %v3708_v56  ;;  %v3284_v56 = vld [vmem:[%s4722_s2 + $0xa8] sm:$0xff] }
  0x64   :  { %724 = vmatmul.bf16.gmra.mxu3 %v3722_v57 }
  0x65   :  { %1329 = vmatpush.bf16.msrb.mxu3 %v3284_v56 }
  0x71   :  { %582 = vmatmul.bf16.gmra.mxu0 %v3543_v59 }
  0x72   :  { %631 = vmatmul.bf16.gmra.mxu1 %v3551_v60 }
  0x73   :  { %680 = vmatmul.bf16.gmra.mxu2 %v3710_v61 }
  0x74   :  { %729 = vmatmul.bf16.gmra.mxu3 %v3724_v62 }
  0x81   :  { %587 = vmatmul.bf16.gmra.mxu0 %v3544_v0 }
  0x82   :  { %636 = vmatmul.bf16.gmra.mxu1 %v3552_v1 }
  0x83   :  { %685 = vmatmul.bf16.gmra.mxu2 %v3711_v2  ;;  %v3282_v2 = vld [vmem:[%s4722_s2 + $0x98] sm:$0xff] }
  0x84   :  { %734 = vmatmul.bf16.gmra.mxu3 %v3726_v3 }
  0x91   :  { %592 = vmatmul.bf16.gmra.mxu0 %v3545_v4 }
  0x92   :  { %641 = vmatmul.bf16.gmra.mxu1 %v3553_v5 }
  0x93   :  { %690 = vmatmul.bf16.gmra.mxu2 %v3764_v6 }
  0x94   :  { %739 = vmatmul.bf16.gmra.mxu3 %v3727_v7  ;;  %v3281_v7 = vld [vmem:[%s4722_s2 + $0x90] sm:$0xff] }
  0x9e   :  { %v4068_v8 = vpop.f32.mrf.mxu0 }
  0x9f   :  { %v607_v25 = vpop.f32.mrf.mxu1 }
  0xa0   :  { %v608_v55 = vadd.f32 %v607_v25, %v4068_v8 }
  0xa1   :  { %753 = vmatmul.bf16.vlgmr.msrb.gmra.mxu0 %v3969_v39  ;;  %v3274_v39 = vld [vmem:[%s4722_s2 + $0x58] sm:$0xff] }
  0xa2   :  { %1302 = vmatpush.bf16.msrb.mxu2 %v3274_v39 }
  0xa6   :  { %v4071_v9 = vpop.f32.mrf.mxu0  ;;  %v656_v27 = vpop.f32.mrf.mxu2 }
  0xa7   :  { %v705_v30 = vpop.f32.mrf.mxu3  ;;  %v609_v33 = vpop.f32.mrf.mxu1  ;;  %v657_v57 = vadd.f32 %v656_v27, %v608_v55  ;;  %v3279_v27 = vld [vmem:[%s4722_s2 + $0x80] sm:$0xff] }
  0xa8   :  { %v610_v63 = vadd.f32 %v609_v33, %v4071_v9 }
  0xa9   :  { %v706_v60 = vadd.f32 %v705_v30, %v657_v57 }
  0xae   :  { %v4073_v10 = vpop.f32.mrf.mxu0  ;;  %v658_v34 = vpop.f32.mrf.mxu2 }
  0xaf   :  { %v707_v36 = vpop.f32.mrf.mxu3  ;;  %v4136_v42 = vpop.f32.mrf.mxu1  ;;  %v659_v3 = vadd.f32 %v658_v34, %v610_v63 }
  0xb0   :  { %v613_v34 = vadd.f32 %v4136_v42, %v4073_v10 }
  0xb1   :  { %758 = vmatmul.bf16.gmra.mxu0 %v3540_v44  ;;  %v3273_v44 = vld [vmem:[%s4722_s2 + $0x50] sm:$0xff]  ;;  %v708_v8 = vadd.f32 %v707_v36, %v659_v3 }
  0xb2   :  { %1303 = vmatpush.bf16.msrb.mxu2 %v3273_v44 }
  0xb6   :  { %v4075_v11 = vpop.f32.mrf.mxu0  ;;  %v4144_v45 = vpop.f32.mrf.mxu2  ;;  %1304 = vmatpush.bf16.msrb.mxu2 %v3272_v48 }
  0xb7   :  { %v614_v52 = vpop.f32.mrf.mxu1  ;;  %v662_v36 = vadd.f32 %v4144_v45, %v613_v34 }
  0xba   :  { %1305 = vmatpush.bf16.msrb.mxu2 %v3271_v51 }
  0xbe   :  { %v4077_v12 = vpop.f32.mrf.mxu0  ;;  %v663_v53 = vpop.f32.mrf.mxu2 }
  0xbf   :  { %v617_v61 = vpop.f32.mrf.mxu1 }
  0xc0   :  { %v618_v40 = vadd.f32 %v617_v61, %v4077_v12 }
  0xc1   :  { %763 = vmatmul.bf16.gmra.mxu0 %v3541_v49  ;;  %v710_v49 = vpop.f32.mrf.mxu3 }
  0xc2   :  { %v711_v43 = vadd.f32 %v710_v49, %v662_v36  ;;  %v3300_v36 = vld [vmem:[%s4722_s2 + $0x128] sm:$0xff] }
  0xc6   :  { %v4079_v13 = vpop.f32.mrf.mxu0  ;;  %v666_v1 = vpop.f32.mrf.mxu2 }
  0xc7   :  { %v619_v18 = vpop.f32.mrf.mxu1  ;;  %v667_v44 = vadd.f32 %v666_v1, %v618_v40 }
  0xc8   :  { %v620_v10 = vadd.f32 %v619_v18, %v4079_v13 }
  0xc9   :  { %v712_v58 = vpop.f32.mrf.mxu3 }
  0xce   :  { %v4087_v16 = vpop.f32.mrf.mxu0  ;;  %v668_v23 = vpop.f32.mrf.mxu2 }
  0xcf   :  { %v622_v33 = vpop.f32.mrf.mxu1 }
  0xd1   :  { %768 = vmatmul.bf16.gmra.mxu0 %v3542_v54  ;;  %v715_v6 = vpop.f32.mrf.mxu3 }
  0xd2   :  { %v716_v55 = vadd.f32 %v715_v6, %v667_v44 }
  0xd6   :  { %v4089_v17 = vpop.f32.mrf.mxu0  ;;  %v671_v35 = vpop.f32.mrf.mxu2 }
  0xd7   :  { %v624_v50 = vpop.f32.mrf.mxu1 }
  0xd9   :  { %v717_v29 = vpop.f32.mrf.mxu3 }
  0xde   :  { %v4097_v20 = vpop.f32.mrf.mxu0  ;;  %v673_v56 = vpop.f32.mrf.mxu2 }
  0xe1   :  { %773 = vmatmul.bf16.gmra.mxu0 %v3543_v59  ;;  %v3283_v59 = vld [vmem:[%s4722_s2 + $0xa0] sm:$0xff]  ;;  %v720_v41 = vpop.f32.mrf.mxu3 }
  0xe2   :  { %1330 = vmatpush.bf16.msrb.mxu3 %v3283_v59 }
  0xe6   :  { %v4099_v21 = vpop.f32.mrf.mxu0  ;;  %1331 = vmatpush.bf16.msrb.mxu3 %v3282_v2  ;;  %v676_v13 = vpop.f32.mrf.mxu2 }
  0xe9   :  { %v722_v12 = vpop.f32.mrf.mxu3 }
  0xea   :  { %1332 = vmatpush.bf16.msrb.mxu3 %v3281_v7 }
  0xee   :  { %v4107_v24 = vpop.f32.mrf.mxu0  ;;  %1333 = vmatpush.bf16.msrb.mxu3 %v3280_v19  ;;  %v678_v18 = vpop.f32.mrf.mxu2  ;;  %v623_v19 = vadd.f32 %v622_v33, %v4087_v16  ;;  %v625_v16 = vadd.f32 %v624_v50, %v4089_v17 }
  0xf1   :  { %778 = vmatmul.bf16.gmra.mxu0 %v3544_v0 }
  0xf2   :  { %1334 = vmatpush.bf16.msrb.mxu3 %v3279_v27 }
  0xf6   :  { %v4109_v26 = vpop.f32.mrf.mxu0 }
  0xfe   :  { %v4117_v31 = vpop.f32.mrf.mxu0 }
 0x101   :  { %783 = vmatmul.bf16.gmra.mxu0 %v3545_v4 }
 0x106   :  { %v4125_v37 = vpop.f32.mrf.mxu0 }
 0x10e   :  { %v4146_v46 = vpop.f32.mrf.mxu0 }
 0x111   :  { %788 = vmatmul.bf16.gmra.mxu0 %v3554_v47  ;;  %v615_v47 = vadd.f32 %v614_v52, %v4075_v11  ;;  %v627_v11 = vpop.f32.mrf.mxu1 }
 0x113   :  { %v664_v51 = vadd.f32 %v663_v53, %v615_v47 }
 0x115   :  { %v713_v59 = vadd.f32 %v712_v58, %v664_v51 }
 0x116   :  { %v4160_v54 = vpop.f32.mrf.mxu0 }
 0x11e   :  { %v754_v62 = vpop.f32.mrf.mxu0 }
 0x11f   :  { %v755_v0 = vadd.f32 %v754_v62, %v706_v60  ;;  %v669_v60 = vadd.f32 %v668_v23, %v620_v10  ;;  %v3293_v23 = vld [vmem:[%s4722_s2 + $0xf0] sm:$0xff]  ;;  %v3291_v10 = vld [vmem:[%s4722_s2 + $0xe0] sm:$0xff] }
 0x121   :  { %v794_v4 = vmul.f32 0.2, %v755_v0 }
 0x123   :  { %v810_v5 = vmax.f32 %v755_v0, %v794_v4  ;;  %v718_v0 = vadd.f32 %v717_v29, %v669_v60  ;;  %v628_v29 = vadd.f32 %v627_v11, %v4097_v20 }
 0x125   :  { %v826_v14 = vpack.c.bf16 %v810_v5, %v810_v5  ;;  %v725_v5 = vpop.f32.mrf.mxu3 }
 0x126   :  { %v756_v15 = vpop.f32.mrf.mxu0 }
 0x127   :  { %834 = vst [vmem:[#allocation2 + $0x4] sm:$0xf] %v826_v14  ;;  %v757_v9 = vadd.f32 %v756_v15, %v708_v8  ;;  %v3302_v14 = vld [vmem:[%s4722_s2 + $0x138] sm:$0xff] }
 0x128   :  { %v3294_v15 = vld [vmem:[%s4722_s2 + $0xf8] sm:$0xff]  ;;  %1385 = vmatpush.bf16.msra.mxu2 %v3302_v14 }
 0x129   :  { %v795_v22 = vmul.f32 0.2, %v757_v9  ;;  %1356 = vmatpush.bf16.msra.mxu1 %v3294_v15 }
 0x12b   :  { %v811_v25 = vmax.f32 %v757_v9, %v795_v22  ;;  %v629_v9 = vpop.f32.mrf.mxu1  ;;  %v3301_v22 = vld [vmem:[%s4722_s2 + $0x130] sm:$0xff] }
 0x12c   :  { %1386 = vmatpush.bf16.msra.mxu2 %v3301_v22 }
 0x12d   :  { %v842_v28 = vpack.c.bf16 %v811_v25, %v811_v25  ;;  %v672_v25 = vadd.f32 %v671_v35, %v623_v19  ;;  %1357 = vmatpush.bf16.msra.mxu1 %v3293_v23  ;;  %v727_v27 = vpop.f32.mrf.mxu3  ;;  %v3292_v35 = vld [vmem:[%s4722_s2 + $0xe8] sm:$0xff] }
 0x12e   :  { %v759_v30 = vpop.f32.mrf.mxu0  ;;  %v3474_v32 = vld [vmem:[#allocation2] sm:$0xff]   ;;  %v3296_v19 = vld [vmem:[%s4722_s2 + $0x108] sm:$0xff] }
 0x12f   :  { %850 = vst [vmem:[#allocation2 + $0x2c] sm:$0xf] %v842_v28  ;;  %1277 = vmatmul.bf16.vlgmr.msrb.gmra.mxu1 %v3474_v32  ;;  %v760_v48 = vadd.f32 %v759_v30, %v711_v43  ;;  %v721_v30 = vadd.f32 %v720_v41, %v672_v25  ;;  %v677_v32 = vadd.f32 %v676_v13, %v628_v29  ;;  %v3295_v29 = vld [vmem:[%s4722_s2 + $0x100] sm:$0xff] }
 0x130   :  { %1387 = vmatpush.bf16.msra.mxu2 %v3300_v36  ;;  %v630_v41 = vadd.f32 %v629_v9, %v4099_v21 }
 0x131   :  { %v796_v42 = vmul.f32 0.2, %v760_v48  ;;  %v726_v40 = vadd.f32 %v725_v5, %v677_v32  ;;  %1358 = vmatpush.bf16.msra.mxu1 %v3292_v35 }
 0x133   :  { %v812_v61 = vmax.f32 %v760_v48, %v796_v42  ;;  %v632_v34 = vpop.f32.mrf.mxu1  ;;  %v679_v48 = vadd.f32 %v678_v18, %v630_v41 }
 0x135   :  { %v730_v17 = vpop.f32.mrf.mxu3  ;;  %v728_v42 = vadd.f32 %v727_v27, %v679_v48  ;;  %1359 = vmatpush.bf16.msra.mxu1 %v3291_v10 }
 0x136   :  { %v761_v38 = vpop.f32.mrf.mxu0  ;;  %v3490_v39 = vld [vmem:[#allocation2 + $0x28] sm:$0xff]  }
 0x137   :  { %1306 = vmatmul.bf16.vlgmr.msrb.gmra.mxu2 %v3490_v39  ;;  %v762_v63 = vadd.f32 %v761_v38, %v713_v59  ;;  %v681_v38 = vpop.f32.mrf.mxu2  ;;  %v674_v39 = vadd.f32 %v673_v56, %v625_v16 }
 0x139   :  { %v797_v53 = vmul.f32 0.2, %v762_v63  ;;  %v723_v47 = vadd.f32 %v722_v12, %v674_v39  ;;  %v3299_v12 = vld [vmem:[%s4722_s2 + $0x120] sm:$0xff] }
 0x13a   :  { %1388 = vmatpush.bf16.msra.mxu2 %v3299_v12 }
 0x13b   :  { %v813_v58 = vmax.f32 %v762_v63, %v797_v53  ;;  %v634_v56 = vpop.f32.mrf.mxu1 }
 0x13c   :  { %v635_v27 = vadd.f32 %v634_v56, %v4109_v26 }
 0x13e   :  { %v764_v57 = vpop.f32.mrf.mxu0 }
 0x13f   :  { %v765_v45 = vadd.f32 %v764_v57, %v716_v55  ;;  %v683_v59 = vpop.f32.mrf.mxu2 }
 0x141   :  { %v798_v62 = vmul.f32 0.2, %v765_v45 }
 0x143   :  { %v814_v49 = vmax.f32 %v765_v45, %v798_v62 }
 0x145   :  { %v4188_v1 = vpack.c.bf16 %v814_v49, %v812_v61  ;;  %v3290_v61 = vld [vmem:[%s4722_s2 + $0xd8] sm:$0xff]  ;;  %v732_v49 = vpop.f32.mrf.mxu3 }
 0x146   :  { %v766_v52 = vpop.f32.mrf.mxu0  ;;  %1360 = vmatpush.bf16.msra.mxu1 %v3290_v61 }
 0x147   :  { %3630 = vst [vmem:[#allocation2 + $0x8] sm:$0xff] %v4188_v1   ;;  %v767_v2 = vadd.f32 %v766_v52, %v718_v0  ;;  %1282 = vmatmul.bf16.gmra.mxu1 %v4188_v1  ;;  %v3289_v52 = vld [vmem:[%s4722_s2 + $0xd0] sm:$0xff]  ;;  %v686_v5 = vpop.f32.mrf.mxu2 }
 0x149   :  { %v799_v3 = vmul.f32 0.2, %v767_v2 }
 0x14a   :  { %1361 = vmatpush.bf16.msra.mxu1 %v3289_v52 }
 0x14b   :  { %v815_v4 = vmax.f32 %v767_v2, %v799_v3  ;;  %v637_v2 = vpop.f32.mrf.mxu1 }
 0x14c   :  { %v638_v18 = vadd.f32 %v637_v2, %v4117_v31 }
 0x14d   :  { %v3461_v6 = vpack.c.bf16 %v815_v4, %v813_v58  ;;  %v3298_v58 = vld [vmem:[%s4722_s2 + $0x118] sm:$0xff]  ;;  %v3288_v4 = vld [vmem:[%s4722_s2 + $0xc8] sm:$0xff]  ;;  %v735_v14 = vpop.f32.mrf.mxu3 }
 0x14e   :  { %v769_v7 = vpop.f32.mrf.mxu0  ;;  %v3735_v8 = vld [vmem:[#allocation2 + $0x4] sm:$0xff]   ;;  %1389 = vmatpush.bf16.msra.mxu2 %v3298_v58  ;;  %1362 = vmatpush.bf16.msra.mxu1 %v3288_v4  ;;  %v687_v23 = vadd.f32 %v686_v5, %v638_v18 }
 0x14f   :  { %3633 = vst [vmem:[#allocation2 + $0x30] sm:$0xff] %v3461_v6   ;;  %1311 = vmatmul.bf16.gmra.mxu2 %v3461_v6  ;;  %1335 = vmatmul.bf16.vlgmr.msrb.gmra.mxu3 %v3735_v8  ;;  %v770_v33 = vadd.f32 %v769_v7, %v721_v30  ;;  %v633_v6 = vadd.f32 %v632_v34, %v4107_v24  ;;  %v3297_v7 = vld [vmem:[%s4722_s2 + $0x110] sm:$0xff]  ;;  %v3287_v8 = vld [vmem:[%s4722_s2 + $0xc0] sm:$0xff]  ;;  %v688_v25 = vpop.f32.mrf.mxu2 }
 0x150   :  { %v684_v30 = vadd.f32 %v683_v59, %v635_v27  ;;  %v736_v32 = vadd.f32 %v735_v14, %v687_v23 }
 0x151   :  { %v800_v43 = vmul.f32 0.2, %v770_v33  ;;  %v682_v15 = vadd.f32 %v681_v38, %v633_v6 }
 0x152   :  { %1390 = vmatpush.bf16.msra.mxu2 %v3297_v7  ;;  %1363 = vmatpush.bf16.msra.mxu1 %v3287_v8  ;;  %v733_v35 = vadd.f32 %v732_v49, %v684_v30 }
 0x153   :  { %v816_v51 = vmax.f32 %v770_v33, %v800_v43  ;;  %v639_v24 = vpop.f32.mrf.mxu1  ;;  %v731_v22 = vadd.f32 %v730_v17, %v682_v15 }
 0x154   :  { %v640_v16 = vadd.f32 %v639_v24, %v4125_v37 }
 0x155   :  { %v737_v31 = vpop.f32.mrf.mxu3 }
 0x156   :  { %v771_v28 = vpop.f32.mrf.mxu0  ;;  %1391 = vmatpush.bf16.msra.mxu2 %v3296_v19  ;;  %v689_v38 = vadd.f32 %v688_v25, %v640_v16  ;;  %v3741_v2 = vld [vmem:[#allocation2 + $0x2c] sm:$0xff]  }
 0x157   :  { %v772_v55 = vadd.f32 %v771_v28, %v723_v47  ;;  %v691_v43 = vpop.f32.mrf.mxu2 }
 0x159   :  { %v801_v60 = vmul.f32 0.2, %v772_v55 }
 0x15a   :  { %1392 = vmatpush.bf16.msra.mxu2 %v3295_v29 }
 0x15b   :  { %v817_v0 = vmax.f32 %v772_v55, %v801_v60 }
 0x15d   :  { %v740_v37 = vpop.f32.mrf.mxu3 }
 0x15e   :  { %v774_v20 = vpop.f32.mrf.mxu0 }
 0x15f   :  { %v775_v44 = vadd.f32 %v774_v20, %v726_v40  ;;  %v642_v40 = vpop.f32.mrf.mxu1  ;;  %v693_v60 = vpop.f32.mrf.mxu2 }
 0x160   :  { %v643_v48 = vadd.f32 %v642_v40, %v4146_v46 }
 0x161   :  { %v802_v50 = vmul.f32 0.2, %v775_v44 }
 0x162   :  { %v692_v55 = vadd.f32 %v691_v43, %v643_v48  ;;  %v1460_v43 = vld [vmem:[%s4723_s4 + $0x60] sm:$0xff]  ;;  %v1459_v48 = vld [vmem:[%s4723_s4 + $0x58] sm:$0xff] }
 0x163   :  { %v818_v57 = vmax.f32 %v775_v44, %v802_v50  ;;  %v738_v44 = vadd.f32 %v737_v31, %v689_v38  ;;  %v1462_v38 = vld [vmem:[%s4723_s4 + $0x70] sm:$0xff] }
 0x164   :  { %v741_v59 = vadd.f32 %v740_v37, %v692_v55  ;;  %v1456_v55 = vld [vmem:[%s4723_s4 + $0x40] sm:$0xff] }
 0x165   :  { %v4217_v45 = vpack.c.bf16 %v818_v57, %v816_v51 }
 0x166   :  { %v776_v21 = vpop.f32.mrf.mxu0 }
 0x167   :  { %3631 = vst [vmem:[#allocation2 + $0x10] sm:$0xff] %v4217_v45   ;;  %v777_v62 = vadd.f32 %v776_v21, %v728_v42  ;;  %1287 = vmatmul.bf16.gmra.mxu1 %v4217_v45  ;;  %v644_v42 = vpop.f32.mrf.mxu1 }
 0x168   :  { %v645_v61 = vadd.f32 %v644_v42, %v4160_v54  ;;  %v1454_v42 = vld [vmem:[%s4723_s4 + $0x30] sm:$0xff] }
 0x169   :  { %v803_v63 = vmul.f32 0.2, %v777_v62 }
 0x16a   :  { %v694_v46 = vadd.f32 %v693_v60, %v645_v61  ;;  %v1452_v60 = vld [vmem:[%s4723_s4 + $0x20] sm:$0xff] }
 0x16b   :  { %v819_v11 = vmax.f32 %v777_v62, %v803_v63 }
 0x16d   :  { %v3466_v53 = vpack.c.bf16 %v819_v11, %v817_v0  ;;  %v742_v0 = vpop.f32.mrf.mxu3 }
 0x16e   :  { %v779_v13 = vpop.f32.mrf.mxu0  ;;  %v3737_v3 = vld [vmem:[#allocation2 + $0xc] sm:$0xff]   ;;  %v743_v52 = vadd.f32 %v742_v0, %v694_v46  ;;  %v1448_v0 = vld [vmem:[%s4723_s4] sm:$0xff] }
 0x16f   :  { %3634 = vst [vmem:[#allocation2 + $0x38] sm:$0xff] %v3466_v53   ;;  %1316 = vmatmul.bf16.gmra.mxu2 %v3466_v53  ;;  %1340 = vmatmul.bf16.gmra.mxu3 %v3737_v3  ;;  %v780_v28 = vadd.f32 %v779_v13, %v731_v22  ;;  %v1449_v46 = vld [vmem:[%s4723_s4 + $0x8] sm:$0xff] }
 0x171   :  { %v804_v33 = vmul.f32 0.2, %v780_v28 }
 0x173   :  { %v820_v20 = vmax.f32 %v780_v28, %v804_v33 }
 0x176   :  { %v781_v9 = vpop.f32.mrf.mxu0  ;;  %v3743_v54 = vld [vmem:[#allocation2 + $0x34] sm:$0xff]  }
 0x177   :  { %v782_v26 = vadd.f32 %v781_v9, %v733_v35  ;;  %v1463_v35 = vld [vmem:[%s4723_s4 + $0x78] sm:$0xff] }
 0x178   :  { %1464 = vmatpush.msra.mxu3 %v1463_v35 }
 0x179   :  { %v805_v50 = vmul.f32 0.2, %v782_v26 }
 0x17a   :  { %1465 = vmatpush.msra.mxu3 %v1462_v38 }
 0x17b   :  { %v821_v10 = vmax.f32 %v782_v26, %v805_v50  ;;  %v1458_v50 = vld [vmem:[%s4723_s4 + $0x50] sm:$0xff] }
 0x17e   :  { %v784_v34 = vpop.f32.mrf.mxu0 }
 0x17f   :  { %v785_v36 = vadd.f32 %v784_v34, %v736_v32 }
 0x181   :  { %v806_v39 = vmul.f32 0.2, %v785_v36 }
 0x183   :  { %v822_v41 = vmax.f32 %v785_v36, %v806_v39 }
 0x185   :  { %v3456_v17 = vpack.c.bf16 %v822_v41, %v820_v20  ;;  %v1461_v41 = vld [vmem:[%s4723_s4 + $0x68] sm:$0xff] }
 0x186   :  { %v786_v47 = vpop.f32.mrf.mxu0  ;;  %1466 = vmatpush.msra.mxu3 %v1461_v41 }
 0x187   :  { %3632 = vst [vmem:[#allocation2 + $0x18] sm:$0xff] %v3456_v17   ;;  %v787_v51 = vadd.f32 %v786_v47, %v738_v44  ;;  %1292 = vmatmul.bf16.gmra.mxu1 %v3456_v17 }
 0x188   :  { %1467 = vmatpush.msra.mxu3 %v1460_v43 }
 0x189   :  { %v807_v57 = vmul.f32 0.2, %v787_v51 }
 0x18a   :  { %1468 = vmatpush.msra.mxu3 %v1459_v48 }
 0x18b   :  { %v823_v56 = vmax.f32 %v787_v51, %v807_v57  ;;  %v1457_v51 = vld [vmem:[%s4723_s4 + $0x48] sm:$0xff] }
 0x18c   :  { %1469 = vmatpush.msra.mxu3 %v1458_v50 }
 0x18d   :  { %v3471_v21 = vpack.c.bf16 %v823_v56, %v821_v10  ;;  %v1455_v56 = vld [vmem:[%s4723_s4 + $0x38] sm:$0xff] }
 0x18e   :  { %v789_v62 = vpop.f32.mrf.mxu0  ;;  %v3738_v12 = vld [vmem:[#allocation2 + $0x14] sm:$0xff]   ;;  %1470 = vmatpush.msra.mxu3 %v1457_v51 }
 0x18f   :  { %3635 = vst [vmem:[#allocation2 + $0x40] sm:$0xff] %v3471_v21   ;;  %v790_v63 = vadd.f32 %v789_v62, %v741_v59  ;;  %1321 = vmatmul.bf16.gmra.mxu2 %v3471_v21  ;;  %1345 = vmatmul.bf16.gmra.mxu3 %v3738_v12  ;;  %v1453_v59 = vld [vmem:[%s4723_s4 + $0x28] sm:$0xff]  ;;  %v1451_v62 = vld [vmem:[%s4723_s4 + $0x18] sm:$0xff] }
 0x190   :  { %1471 = vmatpush.msra.mxu3 %v1456_v55 }
 0x191   :  { %v808_v49 = vmul.f32 0.2, %v790_v63 }
 0x192   :  { %1472 = vmatpush.msra.mxu3 %v1455_v56 }
 0x193   :  { %v824_v11 = vmax.f32 %v790_v63, %v808_v49  ;;  %v1450_v63 = vld [vmem:[%s4723_s4 + $0x10] sm:$0xff] }
 0x194   :  { %1473 = vmatpush.msra.mxu3 %v1454_v42 }
 0x195   :  { %v833_v53 = vpack.c.bf16 %v824_v11, %v824_v11 }
 0x196   :  { %v791_v13 = vpop.f32.mrf.mxu0  ;;  %v3745_v7 = vld [vmem:[#allocation2 + $0x3c] sm:$0xff]   ;;  %1474 = vmatpush.msra.mxu3 %v1453_v59 }
 0x197   :  { %841 = vst [vmem:[#allocation2 + $0x20] sm:$0xf] %v833_v53  ;;  %v792_v3 = vadd.f32 %v791_v13, %v743_v52  ;;  %1364 = vmatmul.bf16.vlgmr.msra.gmra.mxu1 %v3741_v2 }
 0x198   :  { %1475 = vmatpush.msra.mxu3 %v1452_v60 }
 0x199   :  { %v809_v58 = vmul.f32 0.2, %v792_v3 }
 0x19a   :  { %1476 = vmatpush.msra.mxu3 %v1451_v62 }
 0x19b   :  { %v825_v4 = vmax.f32 %v792_v3, %v809_v58 }
 0x19c   :  { %1477 = vmatpush.msra.mxu3 %v1450_v63 }
 0x19d   :  { %v849_v5 = vpack.c.bf16 %v825_v4, %v825_v4 }
 0x19e   :  { %v3766_v6 = vld [vmem:[#allocation2 + $0x1c] sm:$0xff]   ;;  %1478 = vmatpush.msra.mxu3 %v1449_v46 }
 0x19f   :  { %857 = vst [vmem:[#allocation2 + $0x48] sm:$0xf] %v849_v5  ;;  %1393 = vmatmul.bf16.vlgmr.msra.gmra.mxu2 %v4188_v1  ;;  %1350 = vmatmul.bf16.gmra.mxu3 %v3766_v6  ;;  %v3642_v22 = vld [vmem:[#allocation2 + $0x20] sm:$0xff]  }
 0x1a0   :  { %1479 = vmatpush.msra.mxu3 %v1448_v0 }
 0x1a2   :  { %1485 = vmatpush.msrb.mxu3 %v1463_v35 }
 0x1a4   :  { %1486 = vmatpush.msrb.mxu3 %v1462_v38 }
 0x1a6   :  { %v3746_v24 = vld [vmem:[#allocation2 + $0x44] sm:$0xff]  ;;  %1487 = vmatpush.msrb.mxu3 %v1461_v41 }
 0x1a7   :  { %1369 = vmatmul.bf16.gmra.mxu1 %v3743_v54 }
 0x1a8   :  { %1488 = vmatpush.msrb.mxu3 %v1460_v43 }
 0x1aa   :  { %1489 = vmatpush.msrb.mxu3 %v1459_v48 }
 0x1ac   :  { %v1278_v8 = vpop.f32.mrf.mxu1  ;;  %1490 = vmatpush.msrb.mxu3 %v1458_v50 }
 0x1ae   :  { %1491 = vmatpush.msrb.mxu3 %v1457_v51 }
 0x1af   :  { %1398 = vmatmul.bf16.gmra.mxu2 %v4217_v45 }
 0x1b0   :  { %1492 = vmatpush.msrb.mxu3 %v1456_v55 }
 0x1b2   :  { %1493 = vmatpush.msrb.mxu3 %v1455_v56 }
 0x1b4   :  { %v1280_v9 = vpop.f32.mrf.mxu1  ;;  %1494 = vmatpush.msrb.mxu3 %v1454_v42 }
 0x1b6   :  { %1495 = vmatpush.msrb.mxu3 %v1453_v59 }
 0x1b7   :  { %1374 = vmatmul.bf16.gmra.mxu1 %v3745_v7 }
 0x1b8   :  { %1496 = vmatpush.msrb.mxu3 %v1452_v60 }
 0x1ba   :  { %v1307_v14 = vpop.f32.mrf.mxu2  ;;  %1497 = vmatpush.msrb.mxu3 %v1451_v62  ;;  %v1564_v62 = vld [vmem:[%s4724_s10 + $0x8] sm:$0xff] }
 0x1bb   :  { %v4256_v15 = vadd.f32 %v1307_v14, %v1278_v8 }
 0x1bc   :  { %1498 = vmatpush.msrb.mxu3 %v1450_v63  ;;  %v3308_v63 = vld [vmem:[%s4725_s3 + $0x28] sm:$0xff] }
 0x1be   :  { %1499 = vmatpush.msrb.mxu3 %v1449_v46 }
 0x1bf   :  { %1403 = vmatmul.bf16.gmra.mxu2 %v3456_v17 }
 0x1c0   :  { %1500 = vmatpush.msrb.mxu3 %v1448_v0 }
 0x1c2   :  { %v1309_v18 = vpop.f32.mrf.mxu2 }
 0x1c3   :  { %v4258_v19 = vadd.f32 %v1309_v18, %v1280_v9 }
 0x1c4   :  { %v1283_v1 = vpop.f32.mrf.mxu1 }
 0x1c7   :  { %1379 = vmatmul.bf16.gmra.mxu1 %v3746_v24 }
 0x1cc   :  { %v1285_v45 = vpop.f32.mrf.mxu1 }
 0x1cf   :  { %1408 = vmatmul.bf16.gmra.mxu2 %v3642_v22 }
 0x1d2   :  { %v1312_v23 = vpop.f32.mrf.mxu2  ;;  %v1336_v39 = vpop.f32.mrf.mxu3 }
 0x1d3   :  { %v4260_v25 = vadd.f32 %v1312_v23, %v1283_v1  ;;  %v1337_v4 = vadd.f32 %v1336_v39, %v4256_v15 }
 0x1da   :  { %v1314_v27 = vpop.f32.mrf.mxu2  ;;  %v1338_v17 = vpop.f32.mrf.mxu3 }
 0x1db   :  { %v4262_v28 = vadd.f32 %v1314_v27, %v1285_v45  ;;  %v1339_v58 = vadd.f32 %v1338_v17, %v4258_v19  ;;  %v3310_v17 = vld [vmem:[%s4725_s3 + $0x38] sm:$0xff] }
 0x1dc   :  { %2006 = vmatpush.bf16.msra.mxu0 %v3310_v17  ;;  %v3305_v17 = vld [vmem:[%s4725_s3 + $0x10] sm:$0xff] }
 0x1e4   :  { %v1288_v29 = vpop.f32.mrf.mxu1 }
 0x1ec   :  { %v1290_v31 = vpop.f32.mrf.mxu1 }
 0x1f2   :  { %v1317_v30 = vpop.f32.mrf.mxu2  ;;  %v1341_v57 = vpop.f32.mrf.mxu3 }
 0x1f3   :  { %v4264_v32 = vadd.f32 %v1317_v30, %v1288_v29  ;;  %v1342_v6 = vadd.f32 %v1341_v57, %v4260_v25 }
 0x1fa   :  { %v1319_v34 = vpop.f32.mrf.mxu2  ;;  %v1343_v12 = vpop.f32.mrf.mxu3 }
 0x1fb   :  { %v4266_v16 = vadd.f32 %v1319_v34, %v1290_v31  ;;  %v1344_v9 = vadd.f32 %v1343_v12, %v4262_v28  ;;  %v1565_v12 = vld [vmem:[%s4724_s10 + $0x10] sm:$0xff] }
 0x204   :  { %v1293_v33 = vpop.f32.mrf.mxu1 }
 0x20c   :  { %v4268_v36 = vpop.f32.mrf.mxu1 }
 0x212   :  { %v1322_v40 = vpop.f32.mrf.mxu2  ;;  %v1346_v11 = vpop.f32.mrf.mxu3 }
 0x213   :  { %v4276_v20 = vadd.f32 %v1322_v40, %v1293_v33  ;;  %v1347_v19 = vadd.f32 %v1346_v11, %v4264_v32  ;;  %v1568_v11 = vld [vmem:[%s4724_s10 + $0x28] sm:$0xff] }
 0x214   :  { %v1365_v26 = vpop.f32.mrf.mxu1 }
 0x215   :  { %v1366_v54 = vadd.f32 %v1365_v26, %v1337_v4  ;;  %v1563_v26 = vld [vmem:[%s4724_s10] sm:$0xff] }
 0x216   :  { %1573 = vperm.xlu0 %3770, %v1563_v26  }
 0x21a   :  { %v4284_v44 = vpop.f32.mrf.mxu2  ;;  %v1348_v2 = vpop.f32.mrf.mxu3 }
 0x21b   :  { %v1349_v25 = vadd.f32 %v1348_v2, %v4266_v16  ;;  %v1325_v41 = vadd.f32 %v4284_v44, %v4268_v36  ;;  %v3309_v44 = vld [vmem:[%s4725_s3 + $0x30] sm:$0xff] }
 0x21c   :  { %v1367_v47 = vpop.f32.mrf.mxu1  ;;  %2007 = vmatpush.bf16.msra.mxu0 %v3309_v44 }
 0x21d   :  { %v1368_v5 = vadd.f32 %v1367_v47, %v1339_v58 }
 0x21e   :  { %1583 = vperm.xlu0 %3770, %v1565_v12  }
 0x220   :  { %2008 = vmatpush.bf16.msra.mxu0 %v3308_v63 }
 0x222   :  { %v1394_v37 = vpop.f32.mrf.mxu2  ;;  %v1351_v7 = vpop.f32.mrf.mxu3 }
 0x223   :  { %v4328_v24 = vadd.f32 %v1394_v37, %v1366_v54  ;;  %v1352_v28 = vadd.f32 %v1351_v7, %v4276_v20  ;;  %v1567_v20 = vld [vmem:[%s4724_s10 + $0x20] sm:$0xff]  ;;  %v1566_v37 = vld [vmem:[%s4724_s10 + $0x18] sm:$0xff]  ;;  %v1569_v54 = vld [vmem:[%s4724_s10 + $0x30] sm:$0xff] }
 0x224   :  { %v1370_v10 = vpop.f32.mrf.mxu1  ;;  %1593 = vperm.xlu1 %3771, %v1567_v20   ;;  %1588 = vperm.xlu2 %3772, %v1566_v37   ;;  %v3306_v7 = vld [vmem:[%s4725_s3 + $0x18] sm:$0xff]  ;;  %v3332_v20 = vld [vmem:[%s4725_s3 + $0xe8] sm:$0xff]  ;;  %v3323_v37 = vld [vmem:[%s4725_s3 + $0xa0] sm:$0xff] }
 0x225   :  { %v1371_v18 = vadd.f32 %v1370_v10, %v1342_v6  ;;  %v1427_v29 = vmul.f32 %v4328_v24, %v4328_v24  ;;  %v1570_v6 = vld [vmem:[%s4724_s10 + $0x38] sm:$0xff] }
 0x226   :  { %1603 = vperm.xlu0 %3770, %v1569_v54   ;;  %v3341_v54 = vld [vmem:[%s4725_s3 + $0x130] sm:$0xff] }
 0x22a   :  { %v1396_v21 = vpop.f32.mrf.mxu2  ;;  %v1353_v43 = vpop.f32.mrf.mxu3 }
 0x22b   :  { %v4325_v8 = vadd.f32 %v1396_v21, %v1368_v5  ;;  %v1354_v55 = vadd.f32 %v1353_v43, %v1325_v41 }
 0x22c   :  { %v1372_v61 = vpop.f32.mrf.mxu1  ;;  %1578 = vperm.xlu1 %3771, %v1564_v62   ;;  %1598 = vperm.xlu2 %3772, %v1568_v11   ;;  %v3303_v62 = vld [vmem:[%s4725_s3] sm:$0xff] }
 0x22d   :  { %v1373_v1 = vadd.f32 %v1372_v61, %v1344_v9  ;;  %v1428_v23 = vmul.f32 %v4325_v8, %v4325_v8  ;;  %v1414_v30 = vadd.f32 %v4325_v8, %v4328_v24  ;;  %v3311_v11 = vld [vmem:[%s4725_s3 + $0x40] sm:$0xff] }
 0x22f   :  { %v1435_v16 = vadd.f32 %v1428_v23, %v1427_v29  ;;  %v3326_v29 = vld [vmem:[%s4725_s3 + $0xb8] sm:$0xff] }
 0x230   :  { %2044 = vmatpush.bf16.msrb.mxu2 %v3326_v29 }
 0x232   :  { %v1399_v49 = vpop.f32.mrf.mxu2 }
 0x233   :  { %v4331_v15 = vadd.f32 %v1399_v49, %v1371_v18 }
 0x234   :  { %v1375_v52 = vpop.f32.mrf.mxu1  ;;  %1608 = vperm.xlu1 %3771, %v1570_v6  }
 0x235   :  { %v1376_v45 = vadd.f32 %v1375_v52, %v1347_v19  ;;  %v1429_v32 = vmul.f32 %v4331_v15, %v4331_v15  ;;  %v1415_v35 = vadd.f32 %v1414_v30, %v4331_v15  ;;  %v3334_v30 = vld [vmem:[%s4725_s3 + $0xf8] sm:$0xff] }
 0x237   :  { %v1436_v47 = vadd.f32 %v1435_v16, %v1429_v32  ;;  %v3325_v16 = vld [vmem:[%s4725_s3 + $0xb0] sm:$0xff] }
 0x238   :  { %2045 = vmatpush.bf16.msrb.mxu2 %v3325_v16  ;;  %v3339_v16 = vld [vmem:[%s4725_s3 + $0x120] sm:$0xff] }
 0x23a   :  { %v1401_v53 = vpop.f32.mrf.mxu2 }
 0x23b   :  { %v4336_v27 = vadd.f32 %v1401_v53, %v1373_v1 }
 0x23c   :  { %v1377_v13 = vpop.f32.mrf.mxu1 }
 0x23d   :  { %v1378_v31 = vadd.f32 %v1377_v13, %v1349_v25  ;;  %v1430_v38 = vmul.f32 %v4336_v27, %v4336_v27  ;;  %v1416_v48 = vadd.f32 %v1415_v35, %v4336_v27  ;;  %v3307_v13 = vld [vmem:[%s4725_s3 + $0x20] sm:$0xff] }
 0x23e   :  { %2009 = vmatpush.bf16.msra.mxu0 %v3307_v13  ;;  %v3327_v13 = vld [vmem:[%s4725_s3 + $0xc0] sm:$0xff] }
 0x23f   :  { %v1437_v57 = vadd.f32 %v1436_v47, %v1430_v38  ;;  %v3316_v38 = vld [vmem:[%s4725_s3 + $0x68] sm:$0xff]  ;;  %v3315_v47 = vld [vmem:[%s4725_s3 + $0x60] sm:$0xff] }
 0x242   :  { %v1404_v3 = vpop.f32.mrf.mxu2  ;;  %2010 = vmatpush.bf16.msra.mxu0 %v3306_v7 }
 0x243   :  { %v4345_v34 = vadd.f32 %v1404_v3, %v1376_v45 }
 0x244   :  { %v1380_v22 = vpop.f32.mrf.mxu1 }
 0x245   :  { %v1381_v39 = vadd.f32 %v1380_v22, %v1352_v28  ;;  %v1431_v50 = vmul.f32 %v4345_v34, %v4345_v34  ;;  %v1417_v10 = vadd.f32 %v1416_v48, %v4345_v34  ;;  %v3318_v28 = vld [vmem:[%s4725_s3 + $0x78] sm:$0xff] }
 0x246   :  { %2025 = vmatpush.bf16.msrb.mxu1 %v3318_v28  ;;  %2011 = vmatpush.bf16.msra.mxu0 %v3305_v17 }
 0x247   :  { %v1438_v42 = vadd.f32 %v1437_v57, %v1431_v50  ;;  %v3304_v50 = vld [vmem:[%s4725_s3 + $0x8] sm:$0xff] }
 0x24a   :  { %v1406_v14 = vpop.f32.mrf.mxu2  ;;  %2012 = vmatpush.bf16.msra.mxu0 %v3304_v50 }
 0x24b   :  { %v4350_v40 = vadd.f32 %v1406_v14, %v1378_v31  ;;  %v3317_v31 = vld [vmem:[%s4725_s3 + $0x70] sm:$0xff] }
 0x24c   :  { %v1382_v36 = vpop.f32.mrf.mxu1  ;;  %2026 = vmatpush.bf16.msrb.mxu1 %v3317_v31 }
 0x24d   :  { %v1432_v56 = vmul.f32 %v4350_v40, %v4350_v40  ;;  %v1418_v59 = vadd.f32 %v1417_v10, %v4350_v40  ;;  %v1383_v21 = vadd.f32 %v1382_v36, %v1354_v55  ;;  %v3331_v36 = vld [vmem:[%s4725_s3 + $0xe0] sm:$0xff]  ;;  %v3314_v55 = vld [vmem:[%s4725_s3 + $0x58] sm:$0xff] }
 0x24e   :  { %v3322_v10 = vld [vmem:[%s4725_s3 + $0x98] sm:$0xff]  ;;  %2013 = vmatpush.bf16.msra.mxu0 %v3303_v62 }
 0x24f   :  { %v1439_v46 = vadd.f32 %v1438_v42, %v1432_v56  ;;  %v3330_v56 = vld [vmem:[%s4725_s3 + $0xd8] sm:$0xff]  ;;  %v3313_v42 = vld [vmem:[%s4725_s3 + $0x50] sm:$0xff] }
 0x250   :  { %2027 = vmatpush.bf16.msrb.mxu1 %v3316_v38 }
 0x252   :  { %v1409_v33 = vpop.f32.mrf.mxu2 }
 0x253   :  { %v4366_v51 = vadd.f32 %v1409_v33, %v1381_v39  ;;  %v3333_v33 = vld [vmem:[%s4725_s3 + $0xf0] sm:$0xff]  ;;  %v3324_v39 = vld [vmem:[%s4725_s3 + $0xa8] sm:$0xff] }
 0x254   :  { %2046 = vmatpush.bf16.msrb.mxu2 %v3324_v39  ;;  %2028 = vmatpush.bf16.msrb.mxu1 %v3315_v47 }
 0x255   :  { %v1433_v60 = vmul.f32 %v4366_v51, %v4366_v51  ;;  %v1419_v49 = vadd.f32 %v1418_v59, %v4366_v51  ;;  %v3321_v59 = vld [vmem:[%s4725_s3 + $0x90] sm:$0xff] }
 0x257   :  { %v1440_v52 = vadd.f32 %v1439_v46, %v1433_v60  ;;  %v3320_v46 = vld [vmem:[%s4725_s3 + $0x88] sm:$0xff] }
 0x258   :  { %2047 = vmatpush.bf16.msrb.mxu2 %v3323_v37  ;;  %2029 = vmatpush.bf16.msrb.mxu1 %v3314_v55  ;;  %v3338_v55 = vld [vmem:[%s4725_s3 + $0x118] sm:$0xff] }
 0x25a   :  { %v1411_v61 = vpop.f32.mrf.mxu2 }
 0x25b   :  { %v4390_v0 = vadd.f32 %v1411_v61, %v1383_v21  ;;  %v3329_v21 = vld [vmem:[%s4725_s3 + $0xd0] sm:$0xff]  ;;  %v3312_v61 = vld [vmem:[%s4725_s3 + $0x48] sm:$0xff] }
 0x25c   :  { %2048 = vmatpush.bf16.msrb.mxu2 %v3322_v10  ;;  %2030 = vmatpush.bf16.msrb.mxu1 %v3313_v42 }
 0x25d   :  { %v1420_v53 = vadd.f32 %v1419_v49, %v4390_v0  ;;  %v1434_v2 = vmul.f32 %v4390_v0, %v4390_v0  ;;  %v3328_v49 = vld [vmem:[%s4725_s3 + $0xc8] sm:$0xff] }
 0x25f   :  { %v1421_v3 = vrot.slane %v1420_v53, 4  ;;  %v1441_v58 = vadd.f32 %v1440_v52, %v1434_v2  ;;  %v3319_v2 = vld [vmem:[%s4725_s3 + $0x80] sm:$0xff] }
 0x260   :  { %2049 = vmatpush.bf16.msrb.mxu2 %v3321_v59  ;;  %2031 = vmatpush.bf16.msrb.mxu1 %v3312_v61 }
 0x261   :  { %v1422_v4 = vadd.f32 %v1421_v3, %v1420_v53  ;;  %v1442_v5 = vrot.slane %v1441_v58, 4 }
 0x263   :  { %v1423_v14 = vrot.slane %v1422_v4, 2  ;;  %v1443_v9 = vadd.f32 %v1442_v5, %v1441_v58  ;;  %v1509_v5 = vld [vmem:[%s4726_s5] sm:$0x1] }
 0x264   :  { %2050 = vmatpush.bf16.msrb.mxu2 %v3320_v46  ;;  %2032 = vmatpush.bf16.msrb.mxu1 %v3311_v11 }
 0x265   :  { %v1424_v18 = vadd.f32 %v1423_v14, %v1422_v4  ;;  %v1444_v22 = vrot.slane %v1443_v9, 2  ;;  %v3342_v4 = vld [vmem:[%s4725_s3 + $0x138] sm:$0xff] }
 0x266   :  { %2082 = vmatpush.bf16.msrb.mxu0 %v3342_v4 }
 0x267   :  { %v1425_v19 = vrot.slane %v1424_v18, 1  ;;  %v1445_v23 = vadd.f32 %v1444_v22, %v1443_v9  ;;  %v1522_v9 = vld [vmem:[%s4727_s6] sm:$0x1] }
 0x268   :  { %2051 = vmatpush.bf16.msrb.mxu2 %v3319_v2 }
 0x269   :  { %v1426_v1 = vadd.f32 %v1425_v19, %v1424_v18  ;;  %v1446_v25 = vrot.slane %v1445_v23, 1 }
 0x26a   :  { %2083 = vmatpush.bf16.msrb.mxu0 %v3341_v54 }
 0x26b   :  { %1480 = vmatmul.f32.vlgmr.msra.gmra.mxu3 %v1426_v1  ;;  %v1447_v45 = vadd.f32 %v1446_v25, %v1445_v23  ;;  %v3340_v1 = vld [vmem:[%s4725_s3 + $0x128] sm:$0xff] }
 0x26c   :  { %2063 = vmatpush.bf16.msra.mxu3 %v3334_v30 }
 0x26e   :  { %2084 = vmatpush.bf16.msrb.mxu0 %v3340_v1 }
 0x270   :  { %2064 = vmatpush.bf16.msra.mxu3 %v3333_v33 }
 0x272   :  { %2085 = vmatpush.bf16.msrb.mxu0 %v3339_v16 }
 0x273   :  { %1501 = vmatmul.f32.vlgmr.msrb.gmra.mxu3 %v1447_v45 }
 0x274   :  { %2065 = vmatpush.bf16.msra.mxu3 %v3332_v20 }
 0x276   :  { %2086 = vmatpush.bf16.msrb.mxu0 %v3338_v55 }
 0x278   :  { %2066 = vmatpush.bf16.msra.mxu3 %v3331_v36 }
 0x27c   :  { %2067 = vmatpush.bf16.msra.mxu3 %v3330_v56 }
 0x27e   :  { %v1589_v19 = vpop.permute.xlu2 %1588 }
 0x280   :  { %2068 = vmatpush.bf16.msra.mxu3 %v3329_v21 }
 0x284   :  { %2069 = vmatpush.bf16.msra.mxu3 %v3328_v49 }
 0x288   :  { %v4497_v3 = vpop.permute.xlu0 %1573  ;;  %2070 = vmatpush.bf16.msra.mxu3 %v3327_v13 }
 0x290   :  { %v1584_v45 = vpop.permute.xlu0 %1583 }
 0x296   :  { %v4489_v53 = vpop.permute.xlu1 %1593 }
 0x298   :  { %v1604_v61 = vpop.permute.xlu0 %1603 }
 0x29e   :  { %v1579_v23 = vpop.permute.xlu1 %1578 }
 0x2a6   :  { %v1609_v42 = vpop.permute.xlu1 %1608 }
 0x2ee   :  { %v1481_v32 = vpop.f32.mrf.mxu3 }
 0x2ef   :  { %v4428_v35 = vmul.f32 0.0078125, %v1481_v32 }
 0x2f1   :  { %v1506_v41 = vmul.f32 %v4428_v35, %v4428_v35 }
 0x2f6   :  { %v1502_v26 = vpop.f32.mrf.mxu3 }
 0x2f7   :  { %v1505_v43 = vmul.f32 0.0078125, %v1502_v26 }
 0x2f9   :  { %v1507_v48 = vsub.f32 %v1505_v43, %v1506_v41 }
 0x2fb   :  { %v1508_v44 = vmax.f32 %v1507_v48, 0.0 }
 0x2fd   :  { %v1510_v57 = vadd.f32 1e-05, %v1508_v44  ;;  %v1599_v44 = vpop.permute.xlu2 %1598 }
 0x2ff   :  { %3774 = vrsqrt.f32 %v1510_v57  ;;  %vm1517_vm1 = vweird.f32 %v1510_v57 }
 0x305   :  { %v3775_v60 = vpop.eup %3774 }
 0x306   :  { %v1512_v12 = vmul.f32 %v3775_v60, %v1510_v57  ;;  %vm1518_vm0 = vweird.f32 %v3775_v60 }
 0x307   :  { %vm1519_vm2 = vmor %vm1517_vm1, %vm1518_vm0 }
 0x308   :  { %v1513_v63 = vmul.f32 %v3775_v60, %v1512_v12 }
 0x30a   :  { %v1514_v52 = vmul.f32 0.5, %v1513_v63  ;;  %v3337_v63 = vld [vmem:[%s4725_s3 + $0x110] sm:$0xff] }
 0x30b   :  { %2087 = vmatpush.bf16.msrb.mxu0 %v3337_v63 }
 0x30c   :  { %v1515_v58 = vsub.f32 1.5, %v1514_v52 }
 0x30e   :  { %v1516_v6 = vmul.f32 %v3775_v60, %v1515_v58 }
 0x310   :  { %v1520_v7 = vsel %vm1519_vm2, %v3775_v60, %v1516_v6  ;;  %v3336_v6 = vld [vmem:[%s4725_s3 + $0x108] sm:$0xff] }
 0x311   :  { %v1521_v14 = vmul.f32 %v1520_v7, %v1509_v5  ;;  %2088 = vmatpush.bf16.msrb.mxu0 %v3336_v6  ;;  %v3335_v7 = vld [vmem:[%s4725_s3 + $0x100] sm:$0xff] }
 0x313   :  { %v1523_v18 = vmul.f32 %v1521_v14, %v4428_v35  ;;  %v1526_v22 = vperm.slane %v1521_v14, 0 }
 0x315   :  { %v1524_v25 = vsub.f32 %v1522_v9, %v1523_v18  ;;  %v1532_v28 = vmul.f32 %v1526_v22, %v4345_v34  ;;  %v1528_v30 = vmul.f32 %v1526_v22, %v4328_v24  ;;  %v1531_v32 = vmul.f32 %v1526_v22, %v4336_v27  ;;  %2089 = vmatpush.bf16.msrb.mxu0 %v3335_v7 }
 0x316   :  { %v1529_v31 = vmul.f32 %v1526_v22, %v4325_v8  ;;  %v1530_v33 = vmul.f32 %v1526_v22, %v4331_v15  ;;  %v1533_v35 = vmul.f32 %v1526_v22, %v4350_v40  ;;  %v1535_v38 = vmul.f32 %v1526_v22, %v4390_v0 }
 0x317   :  { %v1537_v29 = vperm.slane %v1524_v25, 0  ;;  %v1534_v34 = vmul.f32 %v1526_v22, %v4366_v51 }
 0x319   :  { %v1543_v39 = vadd.f32 %v1537_v29, %v1532_v28  ;;  %v1539_v20 = vadd.f32 %v1537_v29, %v1528_v30  ;;  %v1542_v24 = vadd.f32 %v1537_v29, %v1531_v32  ;;  %v1540_v26 = vadd.f32 %v1537_v29, %v1529_v31  ;;  %v2138_v28 = vld [vmem:[%s4728_s7 + $0x78] sm:$0xff]  ;;  %v2136_v30 = vld [vmem:[%s4728_s7 + $0x68] sm:$0xff] }
 0x31a   :  { %v1541_v27 = vadd.f32 %v1537_v29, %v1530_v33  ;;  %v1544_v41 = vadd.f32 %v1537_v29, %v1533_v35  ;;  %v1546_v8 = vadd.f32 %v1537_v29, %v1535_v38  ;;  %v1545_v43 = vadd.f32 %v1537_v29, %v1534_v34  ;;  %v2137_v29 = vld [vmem:[%s4728_s7 + $0x70] sm:$0xff]  ;;  %2139 = vmatpush.msra.mxu1 %v2138_v28  ;;  %v2135_v33 = vld [vmem:[%s4728_s7 + $0x60] sm:$0xff]  ;;  %v2134_v35 = vld [vmem:[%s4728_s7 + $0x58] sm:$0xff] }
 0x31b   :  { %v1551_v17 = vmul.f32 0.2, %v1543_v39  ;;  %v1547_v47 = vmul.f32 0.2, %v1539_v20  ;;  %v1550_v48 = vmul.f32 0.2, %v1542_v24  ;;  %2160 = vmatpush.msra.mxu2 %v2138_v28 }
 0x31c   :  { %v1548_v50 = vmul.f32 0.2, %v1540_v26  ;;  %v1549_v15 = vmul.f32 0.2, %v1541_v27  ;;  %v1552_v37 = vmul.f32 0.2, %v1544_v41  ;;  %2140 = vmatpush.msra.mxu1 %v2137_v29 }
 0x31d   :  { %v1559_v40 = vmax.f32 %v1543_v39, %v1551_v17  ;;  %v1555_v36 = vmax.f32 %v1539_v20, %v1547_v47  ;;  %v1558_v0 = vmax.f32 %v1542_v24, %v1550_v48  ;;  %v1554_v51 = vmul.f32 0.2, %v1546_v8  ;;  %2161 = vmatpush.msra.mxu2 %v2137_v29  ;;  %v2133_v38 = vld [vmem:[%s4728_s7 + $0x50] sm:$0xff]  ;;  %v2132_v20 = vld [vmem:[%s4728_s7 + $0x48] sm:$0xff] }
 0x31e   :  { %v1556_v57 = vmax.f32 %v1540_v26, %v1548_v50  ;;  %v1557_v10 = vmax.f32 %v1541_v27, %v1549_v15  ;;  %v1560_v56 = vmax.f32 %v1544_v41, %v1552_v37  ;;  %v1553_v59 = vmul.f32 0.2, %v1545_v43  ;;  %2141 = vmatpush.msra.mxu1 %v2136_v30  ;;  %v2131_v27 = vld [vmem:[%s4728_s7 + $0x40] sm:$0xff]  ;;  %v2130_v41 = vld [vmem:[%s4728_s7 + $0x38] sm:$0xff]  ;;  %v2128_v47 = vld [vmem:[%s4728_s7 + $0x28] sm:$0xff] }
 0x31f   :  { %v1615_v21 = vmul.f32 %v4489_v53, %v1559_v40  ;;  %v1611_v60 = vmul.f32 %v4497_v3, %v1555_v36  ;;  %v1614_v62 = vmul.f32 %v1589_v19, %v1558_v0  ;;  %v1562_v12 = vmax.f32 %v1546_v8, %v1554_v51  ;;  %2162 = vmatpush.msra.mxu2 %v2136_v30  ;;  %v2127_v50 = vld [vmem:[%s4728_s7 + $0x20] sm:$0xff]  ;;  %v2126_v37 = vld [vmem:[%s4728_s7 + $0x18] sm:$0xff]  ;;  %v2125_v40 = vld [vmem:[%s4728_s7 + $0x10] sm:$0xff] }
 0x320   :  { %v1612_v46 = vmul.f32 %v1579_v23, %v1556_v57  ;;  %v1613_v49 = vmul.f32 %v1584_v45, %v1557_v10  ;;  %v1616_v11 = vmul.f32 %v1599_v44, %v1560_v56  ;;  %v1561_v52 = vmax.f32 %v1545_v43, %v1553_v59  ;;  %2142 = vmatpush.msra.mxu1 %v2135_v33  ;;  %v2129_v43 = vld [vmem:[%s4728_s7 + $0x30] sm:$0xff]  ;;  %v2124_v0 = vld [vmem:[%s4728_s7 + $0x8] sm:$0xff]  ;;  %v2123_v51 = vld [vmem:[%s4728_s7] sm:$0xff] }
 0x321   :  { %v1619_v2 = vpack.c.bf16 %v1611_v60, %v1611_v60  ;;  %v1618_v13 = vmul.f32 %v1609_v42, %v1562_v12  ;;  %2163 = vmatpush.msra.mxu2 %v2135_v33 }
 0x322   :  { %v1627_v58 = vpack.c.bf16 %v1612_v46, %v1612_v46  ;;  %v3512_v4 = vpack.c.bf16 %v1615_v21, %v1613_v49  ;;  %v3517_v5 = vpack.c.bf16 %v1616_v11, %v1614_v62  ;;  %v1617_v53 = vmul.f32 %v1604_v61, %v1561_v52  ;;  %2143 = vmatpush.msra.mxu1 %v2134_v35 }
 0x323   :  { %1623 = vst [vmem:[#allocation3 + $0x4] sm:$0xf] %v1619_v2  ;;  %v1630_v3 = vpack.c.bf16 %v1618_v13, %v1618_v13  ;;  %2164 = vmatpush.msra.mxu2 %v2134_v35 }
 0x324   :  { %1631 = vst [vmem:[#allocation3 + $0x1c] sm:$0xf] %v1627_v58  ;;  %v1622_v54 = vpack.c.bf16 %v1617_v53, %v1617_v53  ;;  %2144 = vmatpush.msra.mxu1 %v2133_v38 }
 0x325   :  { %3678 = vst [vmem:[#allocation3 + $0x8] sm:$0xff] %v3512_v4   ;;  %2165 = vmatpush.msra.mxu2 %v2133_v38  ;;  %v3358_v38 = vld [vmem:[%s4729_s11 + $0x78] sm:$0xff] }
 0x326   :  { %3679 = vst [vmem:[#allocation3 + $0x20] sm:$0xff] %v3517_v5   ;;  %2145 = vmatpush.msra.mxu1 %v2132_v20  ;;  %2307 = vmatpush.bf16.msrb.mxu3 %v3358_v38 }
 0x327   :  { %1634 = vst [vmem:[#allocation3 + $0x28] sm:$0xf] %v1630_v3  ;;  %2166 = vmatpush.msra.mxu2 %v2132_v20  ;;  %v3374_v20 = vld [vmem:[%s4729_s11 + $0xf8] sm:$0xff] }
 0x328   :  { %1626 = vst [vmem:[#allocation3 + $0x10] sm:$0xf] %v1622_v54  ;;  %2146 = vmatpush.msra.mxu1 %v2131_v27 }
 0x329   :  { %2167 = vmatpush.msra.mxu2 %v2131_v27  ;;  %v3365_v27 = vld [vmem:[%s4729_s11 + $0xb0] sm:$0xff] }
 0x32a   :  { %v3520_v14 = vld [vmem:[#allocation3] sm:$0xff]   ;;  %2147 = vmatpush.msra.mxu1 %v2130_v41 }
 0x32b   :  { %2014 = vmatmul.bf16.vlgmr.msra.gmra.mxu0 %v3520_v14  ;;  %v3528_v9 = vld [vmem:[#allocation3 + $0x18] sm:$0xff]   ;;  %2168 = vmatpush.msra.mxu2 %v2130_v41  ;;  %v3373_v41 = vld [vmem:[%s4729_s11 + $0xf0] sm:$0xff] }
 0x32c   :  { %2033 = vmatmul.bf16.vlgmr.msrb.gmra.mxu1 %v3528_v9  ;;  %v3753_v18 = vld [vmem:[#allocation3 + $0x4] sm:$0xff]  }
 0x32d   :  { %v3756_v22 = vld [vmem:[#allocation3 + $0x1c] sm:$0xff]   ;;  %2052 = vmatmul.bf16.vlgmr.msrb.gmra.mxu2 %v3753_v18  ;;  %2148 = vmatpush.msra.mxu1 %v2129_v43 }
 0x32e   :  { %2071 = vmatmul.bf16.vlgmr.msra.gmra.mxu3 %v3756_v22  ;;  %v3757_v1 = vld [vmem:[#allocation3 + $0x24] sm:$0xff]  ;;  %2169 = vmatpush.msra.mxu2 %v2129_v43  ;;  %v3348_v43 = vld [vmem:[%s4729_s11 + $0x28] sm:$0xff] }
 0x32f   :  { %v3768_v19 = vld [vmem:[#allocation3 + $0xc] sm:$0xff]   ;;  %2149 = vmatpush.msra.mxu1 %v2128_v47 }
 0x330   :  { %v3682_v23 = vld [vmem:[#allocation3 + $0x10] sm:$0xff]   ;;  %2170 = vmatpush.msra.mxu2 %v2128_v47  ;;  %v3372_v47 = vld [vmem:[%s4729_s11 + $0xe8] sm:$0xff] }
 0x331   :  { %2150 = vmatpush.msra.mxu1 %v2127_v50 }
 0x332   :  { %2171 = vmatpush.msra.mxu2 %v2127_v50  ;;  %v3355_v50 = vld [vmem:[%s4729_s11 + $0x60] sm:$0xff] }
 0x333   :  { %2151 = vmatpush.msra.mxu1 %v2126_v37 }
 0x334   :  { %2172 = vmatpush.msra.mxu2 %v2126_v37  ;;  %v3363_v37 = vld [vmem:[%s4729_s11 + $0xa0] sm:$0xff] }
 0x335   :  { %2152 = vmatpush.msra.mxu1 %v2125_v40 }
 0x336   :  { %2173 = vmatpush.msra.mxu2 %v2125_v40  ;;  %v3371_v40 = vld [vmem:[%s4729_s11 + $0xe0] sm:$0xff] }
 0x337   :  { %2153 = vmatpush.msra.mxu1 %v2124_v0 }
 0x338   :  { %2174 = vmatpush.msra.mxu2 %v2124_v0  ;;  %v3354_v0 = vld [vmem:[%s4729_s11 + $0x58] sm:$0xff] }
 0x339   :  { %2154 = vmatpush.msra.mxu1 %v2123_v51 }
 0x33a   :  { %2175 = vmatpush.msra.mxu2 %v2123_v51  ;;  %v3362_v51 = vld [vmem:[%s4729_s11 + $0x98] sm:$0xff] }
 0x33b   :  { %2019 = vmatmul.bf16.gmra.mxu0 %v3512_v4 }
 0x33c   :  { %2038 = vmatmul.bf16.gmra.mxu1 %v3517_v5  ;;  %2525 = vmatpush.bf16.msrb.mxu2 %v3374_v20 }
 0x33d   :  { %2057 = vmatmul.bf16.gmra.mxu2 %v3768_v19 }
 0x33e   :  { %2076 = vmatmul.bf16.gmra.mxu3 %v3757_v1 }
 0x340   :  { %2526 = vmatpush.bf16.msrb.mxu2 %v3373_v41 }
 0x344   :  { %2527 = vmatpush.bf16.msrb.mxu2 %v3372_v47 }
 0x348   :  { %2528 = vmatpush.bf16.msrb.mxu2 %v3371_v40 }
 0x34b   :  { %2090 = vmatmul.bf16.vlgmr.msrb.gmra.mxu0 %v3512_v4 }
 0x35b   :  { %2095 = vmatmul.bf16.gmra.mxu0 %v3682_v23 }
 0x3a8   :  { %v2015_v25 = vpop.f32.mrf.mxu0 }
 0x3a9   :  { %v2034_v32 = vpop.f32.mrf.mxu1 }
 0x3aa   :  { %v2035_v55 = vadd.f32 %v2034_v32, %v2015_v25 }
 0x3b0   :  { %v2017_v45 = vpop.f32.mrf.mxu0  ;;  %v2053_v16 = vpop.f32.mrf.mxu2 }
 0x3b1   :  { %v2072_v34 = vpop.f32.mrf.mxu3  ;;  %v2036_v24 = vpop.f32.mrf.mxu1  ;;  %v2054_v42 = vadd.f32 %v2053_v16, %v2035_v55 }
 0x3b2   :  { %v2037_v44 = vadd.f32 %v2036_v24, %v2017_v45  ;;  %v3357_v24 = vld [vmem:[%s4729_s11 + $0x70] sm:$0xff] }
 0x3b3   :  { %v2073_v61 = vadd.f32 %v2072_v34, %v2054_v42  ;;  %v3350_v34 = vld [vmem:[%s4729_s11 + $0x38] sm:$0xff]  ;;  %2308 = vmatpush.bf16.msrb.mxu3 %v3357_v24  ;;  %v3353_v42 = vld [vmem:[%s4729_s11 + $0x50] sm:$0xff] }
 0x3b4   :  { %2368 = vmatpush.bf16.msra.mxu0 %v3350_v34 }
 0x3b8   :  { %v2020_v31 = vpop.f32.mrf.mxu0  ;;  %v2055_v26 = vpop.f32.mrf.mxu2 }
 0x3b9   :  { %v2074_v17 = vpop.f32.mrf.mxu3  ;;  %v2039_v48 = vpop.f32.mrf.mxu1  ;;  %v2056_v10 = vadd.f32 %v2055_v26, %v2037_v44  ;;  %v3349_v26 = vld [vmem:[%s4729_s11 + $0x30] sm:$0xff]  ;;  %v3346_v44 = vld [vmem:[%s4729_s11 + $0x18] sm:$0xff] }
 0x3ba   :  { %v2040_v57 = vadd.f32 %v2039_v48, %v2020_v31  ;;  %2369 = vmatpush.bf16.msra.mxu0 %v3349_v26 }
 0x3bb   :  { %v2075_v60 = vadd.f32 %v2074_v17, %v2056_v10  ;;  %v3364_v17 = vld [vmem:[%s4729_s11 + $0xa8] sm:$0xff] }
 0x3be   :  { %2370 = vmatpush.bf16.msra.mxu0 %v3348_v43 }
 0x3c0   :  { %v2022_v39 = vpop.f32.mrf.mxu0  ;;  %v2058_v15 = vpop.f32.mrf.mxu2 }
 0x3c1   :  { %v2077_v56 = vpop.f32.mrf.mxu3  ;;  %v2059_v59 = vadd.f32 %v2058_v15, %v2040_v57  ;;  %v2041_v21 = vpop.f32.mrf.mxu1  ;;  %v3347_v15 = vld [vmem:[%s4729_s11 + $0x20] sm:$0xff]  ;;  %v3370_v57 = vld [vmem:[%s4729_s11 + $0xd8] sm:$0xff] }
 0x3c2   :  { %v2042_v63 = vadd.f32 %v2041_v21, %v2022_v39  ;;  %v3366_v39 = vld [vmem:[%s4729_s11 + $0xb8] sm:$0xff]  ;;  %2371 = vmatpush.bf16.msra.mxu0 %v3347_v15  ;;  %2529 = vmatpush.bf16.msrb.mxu2 %v3370_v57  ;;  %v3361_v21 = vld [vmem:[%s4729_s11 + $0x90] sm:$0xff] }
 0x3c3   :  { %v2078_v46 = vadd.f32 %v2077_v56, %v2059_v59  ;;  %2446 = vmatpush.bf16.msrb.mxu1 %v3366_v39  ;;  %v3345_v59 = vld [vmem:[%s4729_s11 + $0x10] sm:$0xff] }
 0x3c6   :  { %2372 = vmatpush.bf16.msra.mxu0 %v3346_v44 }
 0x3c7   :  { %2447 = vmatpush.bf16.msrb.mxu1 %v3365_v27 }
 0x3c8   :  { %v2091_v8 = vpop.f32.mrf.mxu0  ;;  %v2060_v62 = vpop.f32.mrf.mxu2 }
 0x3c9   :  { %v2061_v11 = vadd.f32 %v2060_v62, %v2042_v63  ;;  %v4590_v52 = vadd.f32 %v2091_v8, %v2073_v61  ;;  %v2079_v58 = vpop.f32.mrf.mxu3  ;;  %v3356_v8 = vld [vmem:[%s4729_s11 + $0x68] sm:$0xff] }
 0x3ca   :  { %2309 = vmatpush.bf16.msrb.mxu3 %v3356_v8  ;;  %2373 = vmatpush.bf16.msra.mxu0 %v3345_v59  ;;  %v3352_v61 = vld [vmem:[%s4729_s11 + $0x48] sm:$0xff] }
 0x3cb   :  { %v2080_v4 = vadd.f32 %v2079_v58, %v2061_v11  ;;  %v2110_v5 = vmul.f32 %v4590_v52, %v4590_v52  ;;  %2448 = vmatpush.bf16.msrb.mxu1 %v3364_v17  ;;  %v3344_v63 = vld [vmem:[%s4729_s11 + $0x8] sm:$0xff]  ;;  %v3351_v58 = vld [vmem:[%s4729_s11 + $0x40] sm:$0xff] }
 0x3cc   :  { %v3368_v11 = vld [vmem:[%s4729_s11 + $0xc8] sm:$0xff] }
 0x3ce   :  { %2310 = vmatpush.bf16.msrb.mxu3 %v3355_v50  ;;  %2374 = vmatpush.bf16.msra.mxu0 %v3344_v63 }
 0x3cf   :  { %2449 = vmatpush.bf16.msrb.mxu1 %v3363_v37 }
 0x3d0   :  { %v2093_v36 = vpop.f32.mrf.mxu0 }
 0x3d1   :  { %v4588_v49 = vadd.f32 %v2093_v36, %v2075_v60  ;;  %v3369_v60 = vld [vmem:[%s4729_s11 + $0xd0] sm:$0xff] }
 0x3d2   :  { %2311 = vmatpush.bf16.msrb.mxu3 %v3354_v0  ;;  %2530 = vmatpush.bf16.msrb.mxu2 %v3369_v60 }
 0x3d3   :  { %v2111_v13 = vmul.f32 %v4588_v49, %v4588_v49  ;;  %v2101_v53 = vadd.f32 %v4588_v49, %v4590_v52  ;;  %2450 = vmatpush.bf16.msrb.mxu1 %v3362_v51 }
 0x3d5   :  { %v2114_v54 = vadd.f32 %v2111_v13, %v2110_v5  ;;  %v3359_v5 = vld [vmem:[%s4729_s11 + $0x80] sm:$0xff] }
 0x3d6   :  { %2312 = vmatpush.bf16.msrb.mxu3 %v3353_v42  ;;  %2531 = vmatpush.bf16.msrb.mxu2 %v3368_v11 }
 0x3d7   :  { %2451 = vmatpush.bf16.msrb.mxu1 %v3361_v21 }
 0x3d8   :  { %v2096_v12 = vpop.f32.mrf.mxu0 }
 0x3d9   :  { %v4592_v2 = vadd.f32 %v2096_v12, %v2078_v46  ;;  %v3360_v46 = vld [vmem:[%s4729_s11 + $0x88] sm:$0xff] }
 0x3da   :  { %2313 = vmatpush.bf16.msrb.mxu3 %v3352_v61 }
 0x3db   :  { %v2112_v3 = vmul.f32 %v4592_v2, %v4592_v2  ;;  %v2102_v7 = vadd.f32 %v2101_v53, %v4592_v2  ;;  %2452 = vmatpush.bf16.msrb.mxu1 %v3360_v46  ;;  %v3367_v53 = vld [vmem:[%s4729_s11 + $0xc0] sm:$0xff] }
 0x3dc   :  { %2532 = vmatpush.bf16.msrb.mxu2 %v3367_v53 }
 0x3dd   :  { %v2115_v9 = vadd.f32 %v2114_v54, %v2112_v3 }
 0x3de   :  { %2314 = vmatpush.bf16.msrb.mxu3 %v3351_v58 }
 0x3df   :  { %2453 = vmatpush.bf16.msrb.mxu1 %v3359_v5 }
 0x3e0   :  { %v2098_v6 = vpop.f32.mrf.mxu0 }
 0x3e1   :  { %v4603_v14 = vadd.f32 %v2098_v6, %v2080_v4  ;;  %v3343_v4 = vld [vmem:[%s4729_s11] sm:$0xff] }
 0x3e2   :  { %2375 = vmatpush.bf16.msra.mxu0 %v3343_v4 }
 0x3e3   :  { %v2103_v18 = vadd.f32 %v2102_v7, %v4603_v14  ;;  %v2113_v22 = vmul.f32 %v4603_v14, %v4603_v14 }
 0x3e5   :  { %v2104_v19 = vrot.slane %v2103_v18, 4  ;;  %v2116_v1 = vadd.f32 %v2115_v9, %v2113_v22 }
 0x3e7   :  { %v2105_v23 = vadd.f32 %v2104_v19, %v2103_v18  ;;  %v2117_v25 = vrot.slane %v2116_v1, 4  ;;  %v2184_v18 = vld [vmem:[%s4730_s8] sm:$0x1] }
 0x3e9   :  { %v2106_v45 = vrot.slane %v2105_v23, 2  ;;  %v2118_v28 = vadd.f32 %v2117_v25, %v2116_v1 }
 0x3eb   :  { %v2107_v29 = vadd.f32 %v2106_v45, %v2105_v23  ;;  %v2119_v30 = vrot.slane %v2118_v28, 2  ;;  %v2197_v23 = vld [vmem:[%s4731_s9] sm:$0x1] }
 0x3ed   :  { %v2108_v32 = vrot.slane %v2107_v29, 1  ;;  %v2120_v31 = vadd.f32 %v2119_v30, %v2118_v28 }
 0x3ef   :  { %v2109_v16 = vadd.f32 %v2108_v32, %v2107_v29  ;;  %v2121_v33 = vrot.slane %v2120_v31, 1 }
 0x3f1   :  { %2155 = vmatmul.f32.vlgmr.msra.gmra.mxu1 %v2109_v16  ;;  %v2122_v35 = vadd.f32 %v2121_v33, %v2120_v31 }
 0x3f3   :  { %2176 = vmatmul.f32.vlgmr.msra.gmra.mxu2 %v2122_v35 }
 0x46e   :  { %v2156_v48 = vpop.f32.mrf.mxu1 }
 0x46f   :  { %v2159_v36 = vmul.f32 0.03125, %v2156_v48 }
 0x471   :  { %v2181_v10 = vmul.f32 %v2159_v36, %v2159_v36 }
 0x476   :  { %v2177_v55 = vpop.f32.mrf.mxu2 }
 0x477   :  { %v2180_v56 = vmul.f32 0.03125, %v2177_v55 }
 0x479   :  { %v2182_v62 = vsub.f32 %v2180_v56, %v2181_v10 }
 0x47b   :  { %v2183_v12 = vmax.f32 %v2182_v62, 0.0 }
 0x47d   :  { %v2185_v13 = vadd.f32 1e-05, %v2183_v12 }
 0x47f   :  { %3776 = vrsqrt.f32 %v2185_v13  ;;  %vm2192_vm4 = vweird.f32 %v2185_v13 }
 0x485   :  { %v3777_v3 = vpop.eup %3776 }
 0x486   :  { %v2187_v6 = vmul.f32 %v3777_v3, %v2185_v13  ;;  %vm2193_vm3 = vweird.f32 %v3777_v3 }
 0x487   :  { %vm2194_vm5 = vmor %vm2192_vm4, %vm2193_vm3 }
 0x488   :  { %v2188_v54 = vmul.f32 %v3777_v3, %v2187_v6 }
 0x48a   :  { %v2189_v7 = vmul.f32 0.5, %v2188_v54 }
 0x48c   :  { %v2190_v9 = vsub.f32 1.5, %v2189_v7 }
 0x48e   :  { %v2191_v22 = vmul.f32 %v3777_v3, %v2190_v9 }
 0x490   :  { %v2195_v19 = vsel %vm2194_vm5, %v3777_v3, %v2191_v22 }
 0x491   :  { %v2196_v1 = vmul.f32 %v2195_v19, %v2184_v18 }
 0x493   :  { %v2198_v25 = vmul.f32 %v2196_v1, %v2159_v36  ;;  %v2201_v45 = vperm.slane %v2196_v1, 0 }
 0x495   :  { %v2199_v28 = vsub.f32 %v2197_v23, %v2198_v25  ;;  %v2204_v29 = vmul.f32 %v2201_v45, %v4588_v49  ;;  %v2203_v32 = vmul.f32 %v2201_v45, %v4590_v52  ;;  %v2205_v31 = vmul.f32 %v2201_v45, %v4592_v2 }
 0x496   :  { %v2206_v16 = vmul.f32 %v2201_v45, %v4603_v14  ;;  %v18_v2 = vstv %s4732_s12 }
 0x497   :  { %v2208_v30 = vperm.slane %v2199_v28, 0  ;;  %19 = vst [vmem:[#allocation4] sm:$0x1] %v18_v2 }
 0x499   :  { %v2211_v33 = vadd.f32 %v2208_v30, %v2204_v29  ;;  %v2210_v35 = vadd.f32 %v2208_v30, %v2203_v32  ;;  %v2212_v38 = vadd.f32 %v2208_v30, %v2205_v31  ;;  %v2213_v34 = vadd.f32 %v2208_v30, %v2206_v16 }
 0x49b   :  { %v2215_v39 = vmul.f32 0.2, %v2211_v33  ;;  %v2214_v20 = vmul.f32 0.2, %v2210_v35  ;;  %v2216_v24 = vmul.f32 0.2, %v2212_v38 }
 0x49c   :  { %v2217_v26 = vmul.f32 0.2, %v2213_v34 }
 0x49d   :  { %v2219_v27 = vmax.f32 %v2211_v33, %v2215_v39  ;;  %v2218_v41 = vmax.f32 %v2210_v35, %v2214_v20  ;;  %v2220_v8 = vmax.f32 %v2212_v38, %v2216_v24 }
 0x49e   :  { %v2221_v43 = vmax.f32 %v2213_v34, %v2217_v26  ;;  %v3773_v0 = vld [vmem:[#allocation4] ss:$0 sm:$0xff] }
 0x49f   :  { %v2223_v49 = vpack.c.bf16 %v2219_v27, %v2219_v27  ;;  %v2222_v17 = vpack.c.bf16 %v2218_v41, %v2218_v41  ;;  %v2224_v47 = vpack.c.bf16 %v2220_v8, %v2220_v8 }
 0x4a0   :  { %v2225_v52 = vpack.c.bf16 %v2221_v43, %v2221_v43 }
 0x4a1   :  { %2315 = vmatmul.bf16.vlgmr.msrb.gmra.mxu3 %v2223_v49  ;;  %2376 = vmatmul.bf16.vlgmr.msra.gmra.mxu0 %v2222_v17 }
 0x4a2   :  { %2454 = vmatmul.bf16.vlgmr.msrb.gmra.mxu1 %v2224_v47  ;;  %2533 = vmatmul.bf16.vlgmr.msrb.gmra.mxu2 %v2225_v52 }
 0x51e   :  { %v2377_v14 = vpop.f32.mrf.mxu0 }
 0x51f   :  { %v2455_v48 = vpop.f32.mrf.mxu1 }
 0x524   :  { %v2316_v50 = vpop.f32.mrf.mxu3 }
 0x525   :  { %v2378_v15 = vadd.f32 %v2377_v14, %v2316_v50  ;;  %v2534_v37 = vpop.f32.mrf.mxu2 }
 0x526   :  { %v2379_v40 = vpop.f32.mrf.mxu0 }
 0x527   :  { %v2459_v36 = vadd.f32 %v2455_v48, %v2378_v15  ;;  %v2457_v44 = vpop.f32.mrf.mxu1 }
 0x529   :  { %v2538_v51 = vadd.f32 %v2534_v37, %v2459_v36 }
 0x52b   :  { %v2543_v55 = vadd.f32 %v3773_v0, %v2538_v51 }
 0x52c   :  { %v2318_v57 = vpop.f32.mrf.mxu3 }
 0x52d   :  { %2545 = vst.msk [vmem:[%s4733_s13] sm:$0xff] %vm2544_vm6, %v2543_v55  ;;  %v2536_v10 = vpop.f32.mrf.mxu2 }

</bundles_post_ra>
